<compile_context>
chip_gen: v7x
topology: tpu7x:2x2x1
jax: 0.10.0
libtpu: 0.0.40
codegen_flags: <defaults>
</compile_context>

<pallas_src>
import functools

import jax
import jax.numpy as jnp
from jax import lax
from jax.experimental import pallas as pl
from jax.experimental.pallas import tpu as pltpu

LANE = 128
_MASK_NEG = -1e30          # stand-in for -inf on the padded class lanes
_VMEM_LIMIT = 32 * 1024 * 1024


def _round_up(n, m):
    return (n + m - 1) // m * m


def _pad2d(a, rows, cols):
    return jnp.pad(a, ((0, rows - a.shape[0]), (0, cols - a.shape[1])))


def gconv_kernel(a_ref, h_ref, w_ref, b_ref, o_ref):
    """One GraphConv layer for a row tile: relu(concat([A@h, h]) @ [Wr;Wo] + b)."""
    tm = o_ref.shape[0]
    row0 = pl.multiple_of(pl.program_id(0) * tm, tm)
    # Aggregation over ALL source nodes (full h resident, A streamed per tile).
    agg = jnp.dot(a_ref[...], h_ref[...], preferred_element_type=jnp.float32)
    h_self = h_ref[pl.ds(row0, tm), :]                       # root-term rows
    x_cat = jnp.concatenate([agg.astype(h_self.dtype), h_self], axis=-1)
    out = jnp.dot(x_cat, w_ref[...], preferred_element_type=jnp.float32) + b_ref[...]
    o_ref[...] = jnp.maximum(out, 0.0).astype(o_ref.dtype)


def gconv_head_kernel(a_ref, h_ref, w_ref, b_ref,
                      wf1_ref, bf1_ref, wf2_ref, bf2_ref,
                      o_ref, *, num_classes):
    """conv3 + fc1 + relu + (eval dropout = identity) + fc2 + log_softmax."""
    tm = o_ref.shape[0]
    row0 = pl.multiple_of(pl.program_id(0) * tm, tm)
    cd = h_ref.dtype

    agg = jnp.dot(a_ref[...], h_ref[...], preferred_element_type=jnp.float32)
    h_self = h_ref[pl.ds(row0, tm), :]
    x_cat = jnp.concatenate([agg.astype(cd), h_self], axis=-1)
    h3 = jnp.maximum(
        jnp.dot(x_cat, w_ref[...], preferred_element_type=jnp.float32) + b_ref[...],
        0.0)

    # fc1 + relu
    h4 = jnp.maximum(
        jnp.dot(h3.astype(cd), wf1_ref[...], preferred_element_type=jnp.float32)
        + bf1_ref[...], 0.0)

    # F.dropout(p=0.5, training=False) -> identity (eval-mode semantics).

    # fc2
    z = (jnp.dot(h4.astype(cd), wf2_ref[...], preferred_element_type=jnp.float32)
         + bf2_ref[...])

    # Exclude the padded class lanes from the log_softmax reduction.
    lane_idx = lax.broadcasted_iota(jnp.int32, z.shape, dimension=1)
    z = jnp.where(lane_idx < num_classes, z, _MASK_NEG)
    m = jnp.max(z, axis=1, keepdims=True)
    s = z - m
    lse = jnp.log(jnp.sum(jnp.exp(s), axis=1, keepdims=True))
    o_ref[...] = (s - lse).astype(o_ref.dtype)


def graphweave_forward(adj, x, params, *, tm=128, compute_dtype=jnp.bfloat16):
    (w1r, w1o, b1, w2r, w2o, b2, w3r, w3o, b3, wf1, bf1, wf2, bf2) = params
    n, f = x.shape
    num_classes = wf2.shape[1]
    cd = compute_dtype

    n_p = _round_up(n, tm)
    f_p = _round_up(f, LANE)
    c1 = _round_up(w1r.shape[1], LANE)
    c2 = _round_up(w2r.shape[1], LANE)
    c3 = _round_up(w3r.shape[1], LANE)
    cf = _round_up(num_classes, LANE)

    # Pre-stack [Wr; Wo] along K so each GraphConv is a single fused MXU dot.
    def stack_conv(wr, wo, b, cin_p, cout_p):
        w = jnp.concatenate([_pad2d(wr, cin_p, cout_p),
                             _pad2d(wo, cin_p, cout_p)], axis=0).astype(cd)
        return w, _pad2d(b, 1, cout_p).astype(jnp.float32)

    w1, b1p = stack_conv(w1r, w1o, b1, f_p, c1)
    w2, b2p = stack_conv(w2r, w2o, b2, c1, c2)
    w3, b3p = stack_conv(w3r, w3o, b3, c2, c3)
    wf1p = _pad2d(wf1, c3, c3).astype(cd)
    bf1p = _pad2d(bf1, 1, c3).astype(jnp.float32)
    wf2p = _pad2d(wf2, c3, cf).astype(cd)
    bf2p = _pad2d(bf2, 1, cf).astype(jnp.float32)

    a_p = _pad2d(adj, n_p, n_p).astype(cd)   # small edge-count ints -> exact in bf16
    x_p = _pad2d(x, n_p, f_p).astype(cd)

    grid = (n_p // tm,)
    cparams = pltpu.CompilerParams(
        dimension_semantics=("parallel",),        # row tiles shard across TCs
        vmem_limit_bytes=_VMEM_LIMIT)

    def full(shape):
        # Block index never changes across the grid -> stays resident in VMEM.
        return pl.BlockSpec(shape, lambda i: (0, 0))

    def row_tile(cols):
        return pl.BlockSpec((tm, cols), lambda i: (i, 0))

    a_spec = pl.BlockSpec((tm, n_p), lambda i: (i, 0))

    def conv_layer(a, h, w, b):
        cin, cout = h.shape[1], w.shape[1]
        return pl.pallas_call(
            gconv_kernel,
            out_shape=jax.ShapeDtypeStruct((n_p, cout), cd),
            grid=grid,
            in_specs=[a_spec, full((n_p, cin)), full((2 * cin, cout)),
                      full((1, cout))],
            out_specs=row_tile(cout),
            compiler_params=cparams,
        )(a, h, w, b)

    # NOTE: for production Cora (num_features=1433 >> 64), layer 1 should
    # pre-project h @ Wr once and aggregate A @ (h @ Wr); at the lane-padded
    # sizes used here Cin_pad == Cout_pad, so the fused order is already optimal.
    h1 = conv_layer(a_p, x_p, w1, b1p)
    h2 = conv_layer(a_p, h1, w2, b2p)

    out_padded = pl.pallas_call(
        functools.partial(gconv_head_kernel, num_classes=num_classes),
        out_shape=jax.ShapeDtypeStruct((n_p, cf), jnp.float32),
        grid=grid,
        in_specs=[a_spec, full((n_p, c2)), full((2 * c2, c3)), full((1, c3)),
                  full((c3, c3)), full((1, c3)),
                  full((c3, cf)), full((1, cf))],
        out_specs=row_tile(cf),
        compiler_params=cparams,
    )(a_p, h2, w3, b3p, wf1p, bf1p, wf2p, bf2p)

    return out_padded[:n, :num_classes]


def reference_forward(adj, x, params, compute_dtype=jnp.float32):
    """Pure-JAX reference; compute_dtype mirrors the kernel's precision policy."""
    (w1r, w1o, b1, w2r, w2o, b2, w3r, w3o, b3, wf1, bf1, wf2, bf2) = params
    cd = compute_dtype
    a = adj.astype(cd)
    h = x.astype(cd)
    for wr, wo, b in ((w1r, w1o, b1), (w2r, w2o, b2), (w3r, w3o, b3)):
        agg = jnp.dot(a, h, preferred_element_type=jnp.float32).astype(cd)
        pre = (jnp.dot(agg, wr.astype(cd), preferred_element_type=jnp.float32)
               + jnp.dot(h, wo.astype(cd), preferred_element_type=jnp.float32)
               + b)
        h = jnp.maximum(pre, 0.0).astype(cd)
    h4 = jnp.maximum(
        jnp.dot(h, wf1.astype(cd), preferred_element_type=jnp.float32) + bf1, 0.0)
    z = (jnp.dot(h4.astype(cd), wf2.astype(cd), preferred_element_type=jnp.float32)
         + bf2)
    return jax.nn.log_softmax(z, axis=1)


def init_params(key, num_features, num_classes):
    dims = [
        ("w1r", (num_features, 64)), ("w1o", (num_features, 64)), ("b1", (1, 64)),
        ("w2r", (64, 64)), ("w2o", (64, 64)), ("b2", (1, 64)),
        ("w3r", (64, 128)), ("w3o", (64, 128)), ("b3", (1, 128)),
        ("wf1", (128, 128)), ("bf1", (1, 128)),
        ("wf2", (128, num_classes)), ("bf2", (1, num_classes)),
    ]
    keys = jax.random.split(key, len(dims))
    return tuple(
        0.1 * jax.random.normal(k, shape, dtype=jnp.float32)
        for k, (_, shape) in zip(keys, dims)
    )


if __name__ == "__main__":
    N = 32              # nodes (small stand-in for Cora's 2708)
    NUM_FEATURES = 16   # dataset.num_features stand-in (Cora: 1433)
    NUM_CLASSES = 8     # dataset.num_classes stand-in (Cora: 7)

    root = jax.random.PRNGKey(0)
    k_x, k_e, k_p = jax.random.split(root, 3)

    # Node features.
    x = jax.random.normal(k_x, (N, NUM_FEATURES), dtype=jnp.float32)

    # Synthetic edge_index: a ring plus random directed edges.
    ring_src = jnp.arange(N, dtype=jnp.int32)
    ring_dst = (ring_src + 1) % N
    rand_src = jax.random.randint(k_e, (2 * N,), 0, N, dtype=jnp.int32)
    rand_dst = jax.random.randint(jax.random.fold_in(k_e, 1), (2 * N,), 0, N,
                                  dtype=jnp.int32)
    src = jnp.concatenate([ring_src, rand_src])
    dst = jnp.concatenate([ring_dst, rand_dst])
    # Dense adjacency A[target, source]; duplicate edges accumulate, matching
    # PyG GraphConv aggr='add' over a repeated edge_index.
    adj = jnp.zeros((N, N), dtype=jnp.float32).at[dst, src].add(1.0)

    params = init_params(k_p, NUM_FEATURES, NUM_CLASSES)

    out = jax.block_until_ready(jax.jit(graphweave_forward)(adj, x, params))
    assert out.shape == (N, NUM_CLASSES)

    # Tight check vs a reference that mirrors the kernel's precision policy
    # (bf16 MXU operands, f32 accumulation/epilogue): validates the Pallas
    # plumbing (fusion, padding, tiling, class masking) exactly.
    ref_bf16 = reference_forward(adj, x, params, compute_dtype=jnp.bfloat16)
    assert jnp.allclose(out, ref_bf16, atol=2e-3, rtol=2e-3), \
        "mismatch vs bf16 JAX reference"

    # Loose check vs the pure-f32 reference: validates module semantics within
    # bf16 matmul noise.
    ref_f32 = reference_forward(adj, x, params, compute_dtype=jnp.float32)
    assert jnp.allclose(out, ref_f32, atol=0.25, rtol=0.1), \
        "mismatch vs f32 JAX reference"

    print("KERNEL_OK")
</pallas_src>

<mosaic_0001>
module attributes {stable_mosaic.version = 11 : i64} {
  func.func @gconv_kernel(%arg0: i32, %arg1: memref<128x128xbf16, #tpu.memory_space<vmem>>, %arg2: memref<128x128xbf16, #tpu.memory_space<vmem>>, %arg3: memref<256x128xbf16, #tpu.memory_space<vmem>>, %arg4: memref<1x128xf32, #tpu.memory_space<vmem>>, %arg5: memref<128x128xbf16, #tpu.memory_space<vmem>>) attributes {dimension_semantics = [#tpu.dimension_semantics<parallel>], iteration_bounds = array<i64: 1>, scalar_prefetch = 0 : i64, scratch_operands = 0 : i64, tpu.core_type = #tpu.core_type<tc>, window_params = [{transform_indices = @transform_0, window_bounds = array<i64: 128, 128>}, {pipeline_mode = #tpu.pipeline_mode<synchronous>, transform_indices = @transform_1, window_bounds = array<i64: 128, 128>}, {pipeline_mode = #tpu.pipeline_mode<synchronous>, transform_indices = @transform_2, window_bounds = array<i64: 256, 128>}, {pipeline_mode = #tpu.pipeline_mode<synchronous>, transform_indices = @transform_3, window_bounds = array<i64: 1, 128>}, {transform_indices = @transform_4, window_bounds = array<i64: 128, 128>}]} {
    %c128_i32 = arith.constant 128 : i32
    %0 = arith.muli %arg0, %c128_i32 : i32
    %1 = tpu.assume_multiple %0, 128 : i32
    %c0 = arith.constant 0 : index
    %c0_0 = arith.constant 0 : index
    %2 = vector.load %arg1[%c0, %c0_0] : memref<128x128xbf16, #tpu.memory_space<vmem>>, vector<128x128xbf16>
    %c0_1 = arith.constant 0 : index
    %c0_2 = arith.constant 0 : index
    %3 = vector.load %arg2[%c0_1, %c0_2] : memref<128x128xbf16, #tpu.memory_space<vmem>>, vector<128x128xbf16>
    %cst = arith.constant dense<0.000000e+00> : vector<128x128xf32>
    %4 = tpu.matmul %2, %3, %cst {dimension_numbers = #tpu.dot_dimension_numbers<[1], [0], [0], [1], [0, 0, 1, 1], [], []>} : vector<128x128xbf16>, vector<128x128xbf16>, vector<128x128xf32> -> vector<128x128xf32>
    %5 = arith.index_cast %1 : i32 to index
    %c0_3 = arith.constant 0 : index
    %6 = vector.load %arg2[%5, %c0_3] : memref<128x128xbf16, #tpu.memory_space<vmem>>, vector<128x128xbf16>
    %7 = arith.truncf %4 : vector<128x128xf32> to vector<128x128xbf16>
    %8 = tpu.concatenate %7, %6 in 1 : vector<128x128xbf16>, vector<128x128xbf16> -> vector<128x256xbf16>
    %c0_4 = arith.constant 0 : index
    %c0_5 = arith.constant 0 : index
    %9 = vector.load %arg3[%c0_4, %c0_5] : memref<256x128xbf16, #tpu.memory_space<vmem>>, vector<256x128xbf16>
    %cst_6 = arith.constant dense<0.000000e+00> : vector<128x128xf32>
    %10 = tpu.matmul %8, %9, %cst_6 {dimension_numbers = #tpu.dot_dimension_numbers<[1], [0], [0], [1], [0, 0, 1, 1], [], []>} : vector<128x256xbf16>, vector<256x128xbf16>, vector<128x128xf32> -> vector<128x128xf32>
    %c0_7 = arith.constant 0 : index
    %c0_8 = arith.constant 0 : index
    %11 = vector.load %arg4[%c0_7, %c0_8] : memref<1x128xf32, #tpu.memory_space<vmem>>, vector<1x128xf32>
    %12 = vector.broadcast %11 : vector<1x128xf32> to vector<128x128xf32>
    %13 = arith.addf %10, %12 : vector<128x128xf32>
    %cst_9 = arith.constant 0.000000e+00 : f32
    %14 = vector.broadcast %cst_9 : f32 to vector<128x128xf32>
    %15 = arith.maximumf %13, %14 : vector<128x128xf32>
    %16 = arith.truncf %15 : vector<128x128xf32> to vector<128x128xbf16>
    %c0_10 = arith.constant 0 : index
    %c0_11 = arith.constant 0 : index
    %17 = vector.load %arg5[%c0_10, %c0_11] : memref<128x128xbf16, #tpu.memory_space<vmem>>, vector<128x128xbf16>
    tpu.vector_store %arg5[%c0_10, %c0_11], %16 {strides = array<i32>} : memref<128x128xbf16, #tpu.memory_space<vmem>>, vector<128x128xbf16>,
    return
  }
  func.func @transform_0(%arg0: i32) -> (i32, i32) {
    %c0_i32 = arith.constant 0 : i32
    %c0_i32_0 = arith.constant 0 : i32
    return %arg0, %c0_i32 : i32, i32
  }
  func.func @transform_1(%arg0: i32) -> (i32, i32) {
    %c0_i32 = arith.constant 0 : i32
    %c0_i32_0 = arith.constant 0 : i32
    %c0_i32_1 = arith.constant 0 : i32
    return %c0_i32, %c0_i32_0 : i32, i32
  }
  func.func @transform_2(%arg0: i32) -> (i32, i32) {
    %c0_i32 = arith.constant 0 : i32
    %c0_i32_0 = arith.constant 0 : i32
    %c0_i32_1 = arith.constant 0 : i32
    return %c0_i32, %c0_i32_0 : i32, i32
  }
  func.func @transform_3(%arg0: i32) -> (i32, i32) {
    %c0_i32 = arith.constant 0 : i32
    %c0_i32_0 = arith.constant 0 : i32
    %c0_i32_1 = arith.constant 0 : i32
    return %c0_i32, %c0_i32_0 : i32, i32
  }
  func.func @transform_4(%arg0: i32) -> (i32, i32) {
    %c0_i32 = arith.constant 0 : i32
    %c0_i32_0 = arith.constant 0 : i32
    return %arg0, %c0_i32 : i32, i32
  }
}

module attributes {stable_mosaic.version = 11 : i64} {
  func.func @gconv_head_kernel(%arg0: i32, %arg1: memref<128x128xbf16, #tpu.memory_space<vmem>>, %arg2: memref<128x128xbf16, #tpu.memory_space<vmem>>, %arg3: memref<256x128xbf16, #tpu.memory_space<vmem>>, %arg4: memref<1x128xf32, #tpu.memory_space<vmem>>, %arg5: memref<128x128xbf16, #tpu.memory_space<vmem>>, %arg6: memref<1x128xf32, #tpu.memory_space<vmem>>, %arg7: memref<128x128xbf16, #tpu.memory_space<vmem>>, %arg8: memref<1x128xf32, #tpu.memory_space<vmem>>, %arg9: memref<128x128xf32, #tpu.memory_space<vmem>>) attributes {dimension_semantics = [#tpu.dimension_semantics<parallel>], iteration_bounds = array<i64: 1>, scalar_prefetch = 0 : i64, scratch_operands = 0 : i64, tpu.core_type = #tpu.core_type<tc>, window_params = [{transform_indices = @transform_0, window_bounds = array<i64: 128, 128>}, {pipeline_mode = #tpu.pipeline_mode<synchronous>, transform_indices = @transform_1, window_bounds = array<i64: 128, 128>}, {pipeline_mode = #tpu.pipeline_mode<synchronous>, transform_indices = @transform_2, window_bounds = array<i64: 256, 128>}, {pipeline_mode = #tpu.pipeline_mode<synchronous>, transform_indices = @transform_3, window_bounds = array<i64: 1, 128>}, {pipeline_mode = #tpu.pipeline_mode<synchronous>, transform_indices = @transform_4, window_bounds = array<i64: 128, 128>}, {pipeline_mode = #tpu.pipeline_mode<synchronous>, transform_indices = @transform_5, window_bounds = array<i64: 1, 128>}, {pipeline_mode = #tpu.pipeline_mode<synchronous>, transform_indices = @transform_6, window_bounds = array<i64: 128, 128>}, {pipeline_mode = #tpu.pipeline_mode<synchronous>, transform_indices = @transform_7, window_bounds = array<i64: 1, 128>}, {transform_indices = @transform_8, window_bounds = array<i64: 128, 128>}]} {
    %c128_i32 = arith.constant 128 : i32
    %0 = arith.muli %arg0, %c128_i32 : i32
    %1 = tpu.assume_multiple %0, 128 : i32
    %c0 = arith.constant 0 : index
    %c0_0 = arith.constant 0 : index
    %2 = vector.load %arg1[%c0, %c0_0] : memref<128x128xbf16, #tpu.memory_space<vmem>>, vector<128x128xbf16>
    %c0_1 = arith.constant 0 : index
    %c0_2 = arith.constant 0 : index
    %3 = vector.load %arg2[%c0_1, %c0_2] : memref<128x128xbf16, #tpu.memory_space<vmem>>, vector<128x128xbf16>
    %cst = arith.constant dense<0.000000e+00> : vector<128x128xf32>
    %4 = tpu.matmul %2, %3, %cst {dimension_numbers = #tpu.dot_dimension_numbers<[1], [0], [0], [1], [0, 0, 1, 1], [], []>} : vector<128x128xbf16>, vector<128x128xbf16>, vector<128x128xf32> -> vector<128x128xf32>
    %5 = arith.index_cast %1 : i32 to index
    %c0_3 = arith.constant 0 : index
    %6 = vector.load %arg2[%5, %c0_3] : memref<128x128xbf16, #tpu.memory_space<vmem>>, vector<128x128xbf16>
    %7 = arith.truncf %4 : vector<128x128xf32> to vector<128x128xbf16>
    %8 = tpu.concatenate %7, %6 in 1 : vector<128x128xbf16>, vector<128x128xbf16> -> vector<128x256xbf16>
    %c0_4 = arith.constant 0 : index
    %c0_5 = arith.constant 0 : index
    %9 = vector.load %arg3[%c0_4, %c0_5] : memref<256x128xbf16, #tpu.memory_space<vmem>>, vector<256x128xbf16>
    %cst_6 = arith.constant dense<0.000000e+00> : vector<128x128xf32>
    %10 = tpu.matmul %8, %9, %cst_6 {dimension_numbers = #tpu.dot_dimension_numbers<[1], [0], [0], [1], [0, 0, 1, 1], [], []>} : vector<128x256xbf16>, vector<256x128xbf16>, vector<128x128xf32> -> vector<128x128xf32>
    %c0_7 = arith.constant 0 : index
    %c0_8 = arith.constant 0 : index
    %11 = vector.load %arg4[%c0_7, %c0_8] : memref<1x128xf32, #tpu.memory_space<vmem>>, vector<1x128xf32>
    %12 = vector.broadcast %11 : vector<1x128xf32> to vector<128x128xf32>
    %13 = arith.addf %10, %12 : vector<128x128xf32>
    %cst_9 = arith.constant 0.000000e+00 : f32
    %14 = vector.broadcast %cst_9 : f32 to vector<128x128xf32>
    %15 = arith.maximumf %13, %14 : vector<128x128xf32>
    %16 = arith.truncf %15 : vector<128x128xf32> to vector<128x128xbf16>
    %c0_10 = arith.constant 0 : index
    %c0_11 = arith.constant 0 : index
    %17 = vector.load %arg5[%c0_10, %c0_11] : memref<128x128xbf16, #tpu.memory_space<vmem>>, vector<128x128xbf16>
    %cst_12 = arith.constant dense<0.000000e+00> : vector<128x128xf32>
    %18 = tpu.matmul %16, %17, %cst_12 {dimension_numbers = #tpu.dot_dimension_numbers<[1], [0], [0], [1], [0, 0, 1, 1], [], []>} : vector<128x128xbf16>, vector<128x128xbf16>, vector<128x128xf32> -> vector<128x128xf32>
    %c0_13 = arith.constant 0 : index
    %c0_14 = arith.constant 0 : index
    %19 = vector.load %arg6[%c0_13, %c0_14] : memref<1x128xf32, #tpu.memory_space<vmem>>, vector<1x128xf32>
    %20 = vector.broadcast %19 : vector<1x128xf32> to vector<128x128xf32>
    %21 = arith.addf %18, %20 : vector<128x128xf32>
    %cst_15 = arith.constant 0.000000e+00 : f32
    %22 = vector.broadcast %cst_15 : f32 to vector<128x128xf32>
    %23 = arith.maximumf %21, %22 : vector<128x128xf32>
    %24 = arith.truncf %23 : vector<128x128xf32> to vector<128x128xbf16>
    %c0_16 = arith.constant 0 : index
    %c0_17 = arith.constant 0 : index
    %25 = vector.load %arg7[%c0_16, %c0_17] : memref<128x128xbf16, #tpu.memory_space<vmem>>, vector<128x128xbf16>
    %cst_18 = arith.constant dense<0.000000e+00> : vector<128x128xf32>
    %26 = tpu.matmul %24, %25, %cst_18 {dimension_numbers = #tpu.dot_dimension_numbers<[1], [0], [0], [1], [0, 0, 1, 1], [], []>} : vector<128x128xbf16>, vector<128x128xbf16>, vector<128x128xf32> -> vector<128x128xf32>
    %c0_19 = arith.constant 0 : index
    %c0_20 = arith.constant 0 : index
    %27 = vector.load %arg8[%c0_19, %c0_20] : memref<1x128xf32, #tpu.memory_space<vmem>>, vector<1x128xf32>
    %28 = vector.broadcast %27 : vector<1x128xf32> to vector<128x128xf32>
    %29 = arith.addf %26, %28 : vector<128x128xf32>
    %30 = tpu.iota {dimensions = array<i32: 1>} : vector<128x128xi32>
    %c8_i32 = arith.constant 8 : i32
    %31 = vector.broadcast %c8_i32 : i32 to vector<128x128xi32>
    %32 = arith.cmpi slt, %30, %31 : vector<128x128xi32>
    %cst_21 = arith.constant -1.000000e+30 : f32
    %33 = vector.broadcast %cst_21 : f32 to vector<128x128xf32>
    %34 = arith.select %32, %29, %33 : vector<128x128xi1>, vector<128x128xf32>
    %cst_22 = arith.constant dense<0xFF800000> : vector<128xf32>
    %35 = vector.multi_reduction <maximumf>, %34, %cst_22 [1] : vector<128x128xf32> to vector<128xf32>
    %36 = vector.shape_cast %35 : vector<128xf32> to vector<128x1xf32>
    %37 = vector.broadcast %36 : vector<128x1xf32> to vector<128x128xf32>
    %38 = arith.subf %34, %37 : vector<128x128xf32>
    %39 = math.exp %38 : vector<128x128xf32>
    %cst_23 = arith.constant dense<0.000000e+00> : vector<128xf32>
    %40 = vector.multi_reduction <add>, %39, %cst_23 [1] : vector<128x128xf32> to vector<128xf32>
    %41 = vector.shape_cast %40 : vector<128xf32> to vector<128x1xf32>
    %42 = math.log %41 : vector<128x1xf32>
    %43 = vector.broadcast %42 : vector<128x1xf32> to vector<128x128xf32>
    %44 = arith.subf %38, %43 : vector<128x128xf32>
    %c0_24 = arith.constant 0 : index
    %c0_25 = arith.constant 0 : index
    %45 = vector.load %arg9[%c0_24, %c0_25] : memref<128x128xf32, #tpu.memory_space<vmem>>, vector<128x128xf32>
    tpu.vector_store %arg9[%c0_24, %c0_25], %44 {strides = array<i32>} : memref<128x128xf32, #tpu.memory_space<vmem>>, vector<128x128xf32>,
    return
  }
  func.func @transform_0(%arg0: i32) -> (i32, i32) {
    %c0_i32 = arith.constant 0 : i32
    %c0_i32_0 = arith.constant 0 : i32
    return %arg0, %c0_i32 : i32, i32
  }
  func.func @transform_1(%arg0: i32) -> (i32, i32) {
    %c0_i32 = arith.constant 0 : i32
    %c0_i32_0 = arith.constant 0 : i32
    %c0_i32_1 = arith.constant 0 : i32
    return %c0_i32, %c0_i32_0 : i32, i32
  }
  func.func @transform_2(%arg0: i32) -> (i32, i32) {
    %c0_i32 = arith.constant 0 : i32
    %c0_i32_0 = arith.constant 0 : i32
    %c0_i32_1 = arith.constant 0 : i32
    return %c0_i32, %c0_i32_0 : i32, i32
  }
  func.func @transform_3(%arg0: i32) -> (i32, i32) {
    %c0_i32 = arith.constant 0 : i32
    %c0_i32_0 = arith.constant 0 : i32
    %c0_i32_1 = arith.constant 0 : i32
    return %c0_i32, %c0_i32_0 : i32, i32
  }
  func.func @transform_4(%arg0: i32) -> (i32, i32) {
    %c0_i32 = arith.constant 0 : i32
    %c0_i32_0 = arith.constant 0 : i32
    %c0_i32_1 = arith.constant 0 : i32
    return %c0_i32, %c0_i32_0 : i32, i32
  }
  func.func @transform_5(%arg0: i32) -> (i32, i32) {
    %c0_i32 = arith.constant 0 : i32
    %c0_i32_0 = arith.constant 0 : i32
    %c0_i32_1 = arith.constant 0 : i32
    return %c0_i32, %c0_i32_0 : i32, i32
  }
  func.func @transform_6(%arg0: i32) -> (i32, i32) {
    %c0_i32 = arith.constant 0 : i32
    %c0_i32_0 = arith.constant 0 : i32
    %c0_i32_1 = arith.constant 0 : i32
    return %c0_i32, %c0_i32_0 : i32, i32
  }
  func.func @transform_7(%arg0: i32) -> (i32, i32) {
    %c0_i32 = arith.constant 0 : i32
    %c0_i32_0 = arith.constant 0 : i32
    %c0_i32_1 = arith.constant 0 : i32
    return %c0_i32, %c0_i32_0 : i32, i32
  }
  func.func @transform_8(%arg0: i32) -> (i32, i32) {
    %c0_i32 = arith.constant 0 : i32
    %c0_i32_0 = arith.constant 0 : i32
    return %arg0, %c0_i32 : i32, i32
  }
}

</mosaic_0001>

<bundles_post_ra>
// kernel: graphweave_forward.3
= control target key start
LH: loop header
LB: loop body
LE: loop exit
PB: predicated region body
PF: predicated region fallthrough
CT: control target
= control target key end

     0   :  { %s1132_s1 = inlined_call_operand.vmem [shape: bf16[128,128], index: 1, kind: input, shape index: {}]   ;;  %s1133_s0 = inlined_call_operand.vmem [shape: bf16[128,128], index: 0, kind: input, shape index: {}]   ;;  %s1134_s2 = inlined_call_operand.vmem [shape: bf16[256,128], index: 2, kind: input, shape index: {}]   ;;  %s1135_s3 = inlined_call_operand.vmem [shape: f32[1,128], index: 3, kind: input, shape index: {}]   ;;  %s1136_s4 = inlined_call_operand.vmem [shape: bf16[128,128], index: 4, kind: output, shape index: {}]  }
   0x1   :  { %v902_v0 = vld [vmem:[%s1132_s1] sm:$0xff]   ;;  %v903_v1 = vld [vmem:[%s1132_s1 + $0x8] sm:$0xff]   ;;  %v904_v2 = vld [vmem:[%s1132_s1 + $0x10] sm:$0xff]  }
   0x2   :  { %854 = vmatprep.subr.bf16.mxu0 %v902_v0  ;;  %v905_v3 = vld [vmem:[%s1132_s1 + $0x18] sm:$0xff]   ;;  %v910_v4 = vld [vmem:[%s1133_s0] sm:$0xff]   ;;  %v907_v6 = vld [vmem:[%s1132_s1 + $0x28] sm:$0xff]  }
   0x3   :  { %855 = vmatpush3.bf16.msra.mxu0 %v902_v0  ;;  %870 = vmatprep.mubr.bf16.mxu0 %v910_v4  ;;  %v906_v5 = vld [vmem:[%s1132_s1 + $0x20] sm:$0xff]   ;;  %v920_v9 = vld [vmem:[%s1134_s2 + $0x48] sm:$0xff]   ;;  %v908_v10 = vld [vmem:[%s1132_s1 + $0x30] sm:$0xff]  }
   0x4   :  { %856 = vmatprep.subr.bf16.mxu0 %v903_v1  ;;  %v918_v7 = vld [vmem:[%s1134_s2 + $0x40] sm:$0xff]   ;;  %v921_v11 = vld [vmem:[%s1134_s2 + $0x8] sm:$0xff]   ;;  %v922_v12 = vld [vmem:[%s1134_s2 + $0x50] sm:$0xff]  }
   0x5   :  { %v919_v8 = vld [vmem:[%s1134_s2] sm:$0xff]   ;;  %886 = vmatprep.subr.bf16.mxu1 %v918_v7  ;;  %v909_v13 = vld [vmem:[%s1132_s1 + $0x38] sm:$0xff]   ;;  %v923_v14 = vld [vmem:[%s1134_s2 + $0x10] sm:$0xff]  }
   0x6   :  { %894 = vmatpush3.bf16.msra.mxu1 %v919_v8  ;;  %v924_v15 = vld [vmem:[%s1134_s2 + $0x58] sm:$0xff]   ;;  %v911_v16 = vld [vmem:[%s1133_s0 + $0x8] sm:$0xff]   ;;  %v912_v18 = vld [vmem:[%s1133_s0 + $0x10] sm:$0xff]  }
   0x7   :  { %857 = vmatpush3.bf16.msra.mxu0 %v903_v1  ;;  %887 = vmatprep.subr.bf16.mxu1 %v920_v9  ;;  %v925_v17 = vld [vmem:[%s1134_s2 + $0x18] sm:$0xff]   ;;  %v926_v19 = vld [vmem:[%s1134_s2 + $0x60] sm:$0xff]   ;;  %v928_v21 = vld [vmem:[%s1134_s2 + $0x68] sm:$0xff]  }
   0x8   :  { %858 = vmatprep.subr.bf16.mxu0 %v904_v2  ;;  %v927_v20 = vld [vmem:[%s1134_s2 + $0x20] sm:$0xff]   ;;  %v913_v22 = vld [vmem:[%s1133_s0 + $0x18] sm:$0xff]   ;;  %v929_v23 = vld [vmem:[%s1134_s2 + $0x28] sm:$0xff]  }
   0x9   :  { %v914_v24 = vld [vmem:[%s1133_s0 + $0x20] sm:$0xff]   ;;  %v930_v25 = vld [vmem:[%s1134_s2 + $0x70] sm:$0xff]   ;;  %v915_v27 = vld [vmem:[%s1133_s0 + $0x28] sm:$0xff]  }
   0xa   :  { %895 = vmatpush3.bf16.msra.mxu1 %v921_v11  ;;  %v931_v26 = vld [vmem:[%s1134_s2 + $0x30] sm:$0xff]   ;;  %v917_v29 = vld [vmem:[%s1133_s0 + $0x38] sm:$0xff]   ;;  %v934_v32 = vld [vmem:[%s1132_s1] sm:$0xff]  }
   0xb   :  { %859 = vmatpush3.bf16.msra.mxu0 %v904_v2  ;;  %888 = vmatprep.subr.bf16.mxu1 %v922_v12  ;;  %v916_v28 = vld [vmem:[%s1133_s0 + $0x30] sm:$0xff]   ;;  %v932_v30 = vld [vmem:[%s1134_s2 + $0x78] sm:$0xff]   ;;  %v935_v39 = vld [vmem:[%s1132_s1 + $0x8] sm:$0xff]  }
   0xc   :  { %860 = vmatprep.subr.bf16.mxu0 %v905_v3  ;;  %v933_v31 = vld [vmem:[%s1134_s2 + $0x38] sm:$0xff]   ;;  %v936_v33 = vld [vmem:[%s1132_s1 + $0x10] sm:$0xff]   ;;  %v938_v53 = vld [vmem:[%s1132_s1 + $0x20] sm:$0xff]  }
   0xd   :  { %503 = vmatprep.mubr.bf16.mxu1 %v936_v33  ;;  %v937_v46 = vld [vmem:[%s1132_s1 + $0x18] sm:$0xff]   ;;  %v939_v58 = vld [vmem:[%s1132_s1 + $0x28] sm:$0xff]   ;;  %v940_v62 = vld [vmem:[%s1132_s1 + $0x30] sm:$0xff]  }
   0xe   :  { %896 = vmatpush3.bf16.msra.mxu1 %v923_v14  ;;  %v941_v63 = vld [vmem:[%s1132_s1 + $0x38] sm:$0xff]   ;;  %v1090_v1 = vld [vmem:[%s1135_s3] ss:$0 sm:$0xff] }
   0xf   :  { %861 = vmatpush3.bf16.msra.mxu0 %v905_v3  ;;  %889 = vmatprep.subr.bf16.mxu1 %v924_v15 }
  0x10   :  { %862 = vmatprep.subr.bf16.mxu0 %v906_v5 }
  0x12   :  { %897 = vmatpush3.bf16.msra.mxu1 %v925_v17 }
  0x13   :  { %863 = vmatpush3.bf16.msra.mxu0 %v906_v5  ;;  %890 = vmatprep.subr.bf16.mxu1 %v926_v19 }
  0x14   :  { %864 = vmatprep.subr.bf16.mxu0 %v907_v6 }
  0x16   :  { %898 = vmatpush3.bf16.msra.mxu1 %v927_v20 }
  0x17   :  { %865 = vmatpush3.bf16.msra.mxu0 %v907_v6  ;;  %891 = vmatprep.subr.bf16.mxu1 %v928_v21 }
  0x18   :  { %866 = vmatprep.subr.bf16.mxu0 %v908_v10 }
  0x1a   :  { %899 = vmatpush3.bf16.msra.mxu1 %v929_v23 }
  0x1b   :  { %867 = vmatpush3.bf16.msra.mxu0 %v908_v10  ;;  %892 = vmatprep.subr.bf16.mxu1 %v930_v25 }
  0x1c   :  { %868 = vmatprep.subr.bf16.mxu0 %v909_v13 }
  0x1e   :  { %900 = vmatpush3.bf16.msra.mxu1 %v931_v26 }
  0x1f   :  { %869 = vmatpush3.bf16.msra.mxu0 %v909_v13  ;;  %893 = vmatprep.subr.bf16.mxu1 %v932_v30 }
  0x20   :  { %790 = vmatprep.subr.bf16.mxu0 %v918_v7 }
  0x22   :  { %871 = vmatmul.mubr.bf16.vlgmr.msra.gmra.mrb[0].mxu0 %v911_v16  ;;  %901 = vmatpush3.bf16.msra.mxu1 %v933_v31 }
  0x23   :  { %874 = vmatprep.mubr.bf16.mxu0 %v912_v18  ;;  %791 = vmatpush3.bf16.msra.mxu0 %v919_v8 }
  0x24   :  { %792 = vmatprep.subr.bf16.mxu0 %v920_v9 }
  0x27   :  { %793 = vmatpush3.bf16.msra.mxu0 %v921_v11 }
  0x28   :  { %794 = vmatprep.subr.bf16.mxu0 %v922_v12 }
  0x2a   :  { %875 = vmatmul.mubr.bf16.gmra.mrb[4].mxu0 %v913_v22 }
  0x2b   :  { %878 = vmatprep.mubr.bf16.mxu0 %v914_v24  ;;  %795 = vmatpush3.bf16.msra.mxu0 %v923_v14 }
  0x2c   :  { %796 = vmatprep.subr.bf16.mxu0 %v924_v15 }
  0x2f   :  { %797 = vmatpush3.bf16.msra.mxu0 %v925_v17 }
  0x30   :  { %798 = vmatprep.subr.bf16.mxu0 %v926_v19 }
  0x32   :  { %879 = vmatmul.mubr.bf16.gmra.mrb[8].mxu0 %v915_v27 }
  0x33   :  { %882 = vmatprep.mubr.bf16.mxu0 %v916_v28  ;;  %799 = vmatpush3.bf16.msra.mxu0 %v927_v20 }
  0x34   :  { %800 = vmatprep.subr.bf16.mxu0 %v928_v21 }
  0x37   :  { %801 = vmatpush3.bf16.msra.mxu0 %v929_v23 }
  0x38   :  { %802 = vmatprep.subr.bf16.mxu0 %v930_v25 }
  0x3a   :  { %883 = vmatmul.mubr.bf16.gmra.mrb[12].mxu0 %v917_v29 }
  0x3b   :  { %803 = vmatpush3.bf16.msra.mxu0 %v931_v26  ;;  %487 = vmatprep.mubr.bf16.mxu0 %v934_v32 }
  0x3c   :  { %804 = vmatprep.subr.bf16.mxu0 %v932_v30 }
  0x3f   :  { %805 = vmatpush3.bf16.msra.mxu0 %v933_v31 }
  0xf5   :  { %v872_v34 = vpop.f32.mrb[0].mxu0 }
  0xf6   :  { %v181_v35 = vpop.f32.mrb[1].mxu0 }
  0xf7   :  { %v873_v36 = vpop.f32.mrb[2].mxu0 }
  0xf8   :  { %v265_v37 = vpack.c.bf16 %v873_v36, %v872_v34  ;;  %v184_v38 = vpop.f32.mrb[3].mxu0 }
  0xf9   :  { %v264_v40 = vpack.c.bf16 %v184_v38, %v181_v35 }
  0xfb   :  { %488 = vmatmul.mubr.bf16.vlgmr.msra.gmra.mrb[16].mxu0 %v264_v40 }
  0xfc   :  { %495 = vmatprep.mubr.bf16.mxu0 %v935_v39 }
  0xfd   :  { %v876_v41 = vpop.f32.mrb[4].mxu0 }
  0xfe   :  { %v197_v42 = vpop.f32.mrb[5].mxu0 }
  0xff   :  { %v877_v43 = vpop.f32.mrb[6].mxu0 }
 0x100   :  { %v267_v44 = vpack.c.bf16 %v877_v43, %v876_v41  ;;  %v200_v45 = vpop.f32.mrb[7].mxu0 }
 0x101   :  { %v266_v47 = vpack.c.bf16 %v200_v45, %v197_v42 }
 0x103   :  { %496 = vmatmul.mubr.bf16.gmra.mrb[20].mxu0 %v265_v37  ;;  %504 = vmatmul.mubr.bf16.vlgmr.msra.gmra.mrb[0].mxu1 %v266_v47 }
 0x104   :  { %511 = vmatprep.mubr.bf16.mxu1 %v937_v46 }
 0x105   :  { %v880_v48 = vpop.f32.mrb[8].mxu0 }
 0x106   :  { %v213_v49 = vpop.f32.mrb[9].mxu0 }
 0x107   :  { %v881_v50 = vpop.f32.mrb[10].mxu0 }
 0x108   :  { %v269_v51 = vpack.c.bf16 %v881_v50, %v880_v48  ;;  %v216_v52 = vpop.f32.mrb[11].mxu0 }
 0x109   :  { %v268_v54 = vpack.c.bf16 %v216_v52, %v213_v49 }
 0x10b   :  { %512 = vmatmul.mubr.bf16.gmra.mrb[4].mxu1 %v267_v44 }
 0x10c   :  { %519 = vmatprep.mubr.bf16.mxu1 %v938_v53 }
 0x10d   :  { %v884_v55 = vpop.f32.mrb[12].mxu0 }
 0x10e   :  { %v229_v56 = vpop.f32.mrb[13].mxu0 }
 0x10f   :  { %v885_v57 = vpop.f32.mrb[14].mxu0 }
 0x110   :  { %v271_v59 = vpack.c.bf16 %v885_v57, %v884_v55  ;;  %v232_v60 = vpop.f32.mrb[15].mxu0 }
 0x111   :  { %v270_v61 = vpack.c.bf16 %v232_v60, %v229_v56 }
 0x113   :  { %520 = vmatmul.mubr.bf16.gmra.mrb[8].mxu1 %v268_v54 }
 0x114   :  { %527 = vmatprep.mubr.bf16.mxu1 %v939_v58 }
 0x11b   :  { %528 = vmatmul.mubr.bf16.gmra.mrb[12].mxu1 %v269_v51 }
 0x11c   :  { %535 = vmatprep.mubr.bf16.mxu1 %v940_v62 }
 0x123   :  { %536 = vmatmul.mubr.bf16.gmra.mrb[16].mxu1 %v270_v61 }
 0x124   :  { %543 = vmatprep.mubr.bf16.mxu1 %v941_v63 }
 0x12b   :  { %544 = vmatmul.mubr.bf16.gmra.mrb[20].mxu1 %v271_v59 }
 0x1ce   :  { %v806_v0 = vpop.f32.mrb[16].mxu0 }
 0x1cf   :  { %v807_v2 = vpop.f32.mrb[17].mxu0 }
 0x1d0   :  { %v808_v3 = vadd.f32 %v807_v2, %v806_v0  ;;  %v809_v4 = vpop.f32.mrb[18].mxu0 }
 0x1d1   :  { %v810_v5 = vpop.f32.mrb[19].mxu0 }
 0x1d2   :  { %v490_v6 = vadd.f32 %v808_v3, %v1090_v1  ;;  %v811_v7 = vadd.f32 %v810_v5, %v809_v4 }
 0x1d4   :  { %v493_v8 = vadd.f32 %v811_v7, %v1090_v1  ;;  %v552_v9 = vmax.f32 %v490_v6, 0.0 }
 0x1d6   :  { %v553_v10 = vmax.f32 %v493_v8, 0.0  ;;  %v812_v11 = vpop.f32.mrb[20].mxu0  ;;  %v818_v12 = vpop.f32.mrb[0].mxu1 }
 0x1d7   :  { %v813_v13 = vpop.f32.mrb[21].mxu0  ;;  %v819_v14 = vpop.f32.mrb[1].mxu1 }
 0x1d8   :  { %v730_v15 = vpack.c.bf16 %v553_v10, %v552_v9  ;;  %v814_v16 = vadd.f32 %v813_v13, %v812_v11  ;;  %v820_v17 = vadd.f32 %v819_v14, %v818_v12  ;;  %v815_v18 = vpop.f32.mrb[22].mxu0  ;;  %v821_v19 = vpop.f32.mrb[2].mxu1 }
 0x1d9   :  { %v816_v20 = vpop.f32.mrb[23].mxu0  ;;  %v822_v21 = vpop.f32.mrb[3].mxu1 }
 0x1da   :  { %731 = vst [vmem:[%s1136_s4] sm:$0xff] %v730_v15   ;;  %v498_v22 = vadd.f32 %v814_v16, %v1090_v1  ;;  %v506_v23 = vadd.f32 %v820_v17, %v1090_v1  ;;  %v817_v24 = vadd.f32 %v816_v20, %v815_v18  ;;  %v823_v25 = vadd.f32 %v822_v21, %v821_v19 }
 0x1dc   :  { %v501_v26 = vadd.f32 %v817_v24, %v1090_v1  ;;  %v509_v27 = vadd.f32 %v823_v25, %v1090_v1  ;;  %v554_v28 = vmax.f32 %v498_v22, 0.0  ;;  %v556_v29 = vmax.f32 %v506_v23, 0.0 }
 0x1de   :  { %v555_v30 = vmax.f32 %v501_v26, 0.0  ;;  %v557_v31 = vmax.f32 %v509_v27, 0.0  ;;  %v824_v32 = vpop.f32.mrb[4].mxu1 }
 0x1df   :  { %v825_v33 = vpop.f32.mrb[5].mxu1 }
 0x1e0   :  { %v735_v34 = vpack.c.bf16 %v555_v30, %v554_v28  ;;  %v740_v35 = vpack.c.bf16 %v557_v31, %v556_v29  ;;  %v826_v36 = vadd.f32 %v825_v33, %v824_v32  ;;  %v827_v37 = vpop.f32.mrb[6].mxu1 }
 0x1e1   :  { %v828_v38 = vpop.f32.mrb[7].mxu1 }
 0x1e2   :  { %767 = vst [vmem:[%s1136_s4 + $0x8] sm:$0xff] %v735_v34   ;;  %768 = vst [vmem:[%s1136_s4 + $0x10] sm:$0xff] %v740_v35   ;;  %v514_v39 = vadd.f32 %v826_v36, %v1090_v1  ;;  %v829_v40 = vadd.f32 %v828_v38, %v827_v37 }
 0x1e4   :  { %v517_v41 = vadd.f32 %v829_v40, %v1090_v1  ;;  %v558_v42 = vmax.f32 %v514_v39, 0.0 }
 0x1e6   :  { %v559_v43 = vmax.f32 %v517_v41, 0.0  ;;  %v830_v44 = vpop.f32.mrb[8].mxu1 }
 0x1e7   :  { %v831_v45 = vpop.f32.mrb[9].mxu1 }
 0x1e8   :  { %v745_v46 = vpack.c.bf16 %v559_v43, %v558_v42  ;;  %v832_v47 = vadd.f32 %v831_v45, %v830_v44  ;;  %v833_v48 = vpop.f32.mrb[10].mxu1 }
 0x1e9   :  { %v834_v49 = vpop.f32.mrb[11].mxu1 }
 0x1ea   :  { %769 = vst [vmem:[%s1136_s4 + $0x18] sm:$0xff] %v745_v46   ;;  %v522_v50 = vadd.f32 %v832_v47, %v1090_v1  ;;  %v835_v51 = vadd.f32 %v834_v49, %v833_v48 }
 0x1ec   :  { %v525_v52 = vadd.f32 %v835_v51, %v1090_v1  ;;  %v560_v53 = vmax.f32 %v522_v50, 0.0 }
 0x1ee   :  { %v561_v54 = vmax.f32 %v525_v52, 0.0  ;;  %v836_v55 = vpop.f32.mrb[12].mxu1 }
 0x1ef   :  { %v837_v56 = vpop.f32.mrb[13].mxu1 }
 0x1f0   :  { %v750_v57 = vpack.c.bf16 %v561_v54, %v560_v53  ;;  %v838_v58 = vadd.f32 %v837_v56, %v836_v55  ;;  %v839_v59 = vpop.f32.mrb[14].mxu1 }
 0x1f1   :  { %v840_v60 = vpop.f32.mrb[15].mxu1 }
 0x1f2   :  { %770 = vst [vmem:[%s1136_s4 + $0x20] sm:$0xff] %v750_v57   ;;  %v530_v61 = vadd.f32 %v838_v58, %v1090_v1  ;;  %v841_v62 = vadd.f32 %v840_v60, %v839_v59 }
 0x1f4   :  { %v533_v63 = vadd.f32 %v841_v62, %v1090_v1  ;;  %v562_v0 = vmax.f32 %v530_v61, 0.0 }
 0x1f6   :  { %v563_v2 = vmax.f32 %v533_v63, 0.0  ;;  %v842_v3 = vpop.f32.mrb[16].mxu1 }
 0x1f7   :  { %v843_v4 = vpop.f32.mrb[17].mxu1 }
 0x1f8   :  { %v755_v5 = vpack.c.bf16 %v563_v2, %v562_v0  ;;  %v844_v6 = vadd.f32 %v843_v4, %v842_v3  ;;  %v845_v7 = vpop.f32.mrb[18].mxu1 }
 0x1f9   :  { %v846_v8 = vpop.f32.mrb[19].mxu1 }
 0x1fa   :  { %771 = vst [vmem:[%s1136_s4 + $0x28] sm:$0xff] %v755_v5   ;;  %v538_v9 = vadd.f32 %v844_v6, %v1090_v1  ;;  %v847_v10 = vadd.f32 %v846_v8, %v845_v7 }
 0x1fc   :  { %v541_v11 = vadd.f32 %v847_v10, %v1090_v1  ;;  %v564_v12 = vmax.f32 %v538_v9, 0.0 }
 0x1fe   :  { %v565_v13 = vmax.f32 %v541_v11, 0.0  ;;  %v848_v14 = vpop.f32.mrb[20].mxu1 }
 0x1ff   :  { %v849_v15 = vpop.f32.mrb[21].mxu1 }
 0x200   :  { %v760_v16 = vpack.c.bf16 %v565_v13, %v564_v12  ;;  %v850_v17 = vadd.f32 %v849_v15, %v848_v14  ;;  %v851_v18 = vpop.f32.mrb[22].mxu1 }
 0x201   :  { %v852_v19 = vpop.f32.mrb[23].mxu1 }
 0x202   :  { %772 = vst [vmem:[%s1136_s4 + $0x30] sm:$0xff] %v760_v16   ;;  %v546_v20 = vadd.f32 %v850_v17, %v1090_v1  ;;  %v853_v21 = vadd.f32 %v852_v19, %v851_v18 }
 0x204   :  { %v549_v22 = vadd.f32 %v853_v21, %v1090_v1  ;;  %v566_v23 = vmax.f32 %v546_v20, 0.0 }
 0x206   :  { %v567_v24 = vmax.f32 %v549_v22, 0.0 }
 0x208   :  { %v765_v25 = vpack.c.bf16 %v567_v24, %v566_v23 }
 0x20a   :  { %773 = vst [vmem:[%s1136_s4 + $0x38] sm:$0xff] %v765_v25  }

// kernel: graphweave_forward.5
= control target key start
LH: loop header
LB: loop body
LE: loop exit
PB: predicated region body
PF: predicated region fallthrough
CT: control target
= control target key end

     0   :  { %s1997_s1 = inlined_call_operand.vmem [shape: bf16[128,128], index: 1, kind: input, shape index: {}]   ;;  %s1998_s0 = inlined_call_operand.vmem [shape: bf16[128,128], index: 0, kind: input, shape index: {}]   ;;  %s1999_s2 = inlined_call_operand.vmem [shape: bf16[256,128], index: 2, kind: input, shape index: {}]   ;;  %s2000_s4 = inlined_call_operand.vmem [shape: bf16[128,128], index: 4, kind: input, shape index: {}]   ;;  %s2001_s6 = inlined_call_operand.vmem [shape: bf16[128,128], index: 6, kind: input, shape index: {}]   ;;  %s2002_s3 = inlined_call_operand.vmem [shape: f32[1,128], index: 3, kind: input, shape index: {}]   ;;  %s2003_s5 = inlined_call_operand.vmem [shape: f32[1,128], index: 5, kind: input, shape index: {}]   ;;  %s2004_s7 = inlined_call_operand.vmem [shape: f32[1,128], index: 7, kind: input, shape index: {}]   ;;  %s2005_s8 = inlined_call_operand.vmem [shape: f32[128,128], index: 8, kind: output, shape index: {}]  }
   0x1   :  { %v1432_v0 = vld [vmem:[%s1997_s1] sm:$0xff]   ;;  %v1433_v1 = vld [vmem:[%s1997_s1 + $0x8] sm:$0xff]   ;;  %v1434_v2 = vld [vmem:[%s1997_s1 + $0x10] sm:$0xff]  }
   0x2   :  { %1320 = vmatprep.subr.bf16.mxu0 %v1432_v0  ;;  %v1435_v3 = vld [vmem:[%s1997_s1 + $0x18] sm:$0xff]   ;;  %v1440_v4 = vld [vmem:[%s1998_s0] sm:$0xff]   ;;  %v1437_v6 = vld [vmem:[%s1997_s1 + $0x28] sm:$0xff]  }
   0x3   :  { %1321 = vmatpush3.bf16.msra.mxu0 %v1432_v0  ;;  %1336 = vmatprep.mubr.bf16.mxu0 %v1440_v4  ;;  %v1436_v5 = vld [vmem:[%s1997_s1 + $0x20] sm:$0xff]   ;;  %v1438_v9 = vld [vmem:[%s1997_s1 + $0x30] sm:$0xff]   ;;  %v1450_v10 = vld [vmem:[%s1999_s2 + $0x48] sm:$0xff]  }
   0x4   :  { %1322 = vmatprep.subr.bf16.mxu0 %v1433_v1  ;;  %v1448_v7 = vld [vmem:[%s1999_s2 + $0x40] sm:$0xff]   ;;  %v1451_v11 = vld [vmem:[%s1999_s2 + $0x8] sm:$0xff]   ;;  %v1452_v12 = vld [vmem:[%s1999_s2 + $0x50] sm:$0xff]  }
   0x5   :  { %v1449_v8 = vld [vmem:[%s1999_s2] sm:$0xff]   ;;  %1224 = vmatprep.subr.bf16.mxu1 %v1448_v7  ;;  %v1439_v13 = vld [vmem:[%s1997_s1 + $0x38] sm:$0xff]   ;;  %v1453_v14 = vld [vmem:[%s1999_s2 + $0x10] sm:$0xff]  }
   0x6   :  { %1225 = vmatpush3.bf16.msra.mxu1 %v1449_v8  ;;  %v1454_v15 = vld [vmem:[%s1999_s2 + $0x58] sm:$0xff]   ;;  %v1441_v17 = vld [vmem:[%s1998_s0 + $0x8] sm:$0xff]   ;;  %v1456_v18 = vld [vmem:[%s1999_s2 + $0x60] sm:$0xff]  }
   0x7   :  { %1323 = vmatpush3.bf16.msra.mxu0 %v1433_v1  ;;  %1226 = vmatprep.subr.bf16.mxu1 %v1450_v10  ;;  %v1455_v16 = vld [vmem:[%s1999_s2 + $0x18] sm:$0xff]   ;;  %v1442_v19 = vld [vmem:[%s1998_s0 + $0x10] sm:$0xff]   ;;  %v1457_v20 = vld [vmem:[%s1999_s2 + $0x20] sm:$0xff]  }
   0x8   :  { %1324 = vmatprep.subr.bf16.mxu0 %v1434_v2  ;;  %v1458_v21 = vld [vmem:[%s1999_s2 + $0x68] sm:$0xff]   ;;  %v1460_v23 = vld [vmem:[%s1999_s2 + $0x70] sm:$0xff]   ;;  %v1443_v24 = vld [vmem:[%s1998_s0 + $0x18] sm:$0xff]  }
   0x9   :  { %v1459_v22 = vld [vmem:[%s1999_s2 + $0x28] sm:$0xff]   ;;  %v1444_v25 = vld [vmem:[%s1998_s0 + $0x20] sm:$0xff]   ;;  %v1461_v26 = vld [vmem:[%s1999_s2 + $0x30] sm:$0xff]  }
   0xa   :  { %1227 = vmatpush3.bf16.msra.mxu1 %v1451_v11  ;;  %v1445_v27 = vld [vmem:[%s1998_s0 + $0x28] sm:$0xff]   ;;  %v1446_v28 = vld [vmem:[%s1998_s0 + $0x30] sm:$0xff]   ;;  %v1447_v29 = vld [vmem:[%s1998_s0 + $0x38] sm:$0xff]  }
   0xb   :  { %1325 = vmatpush3.bf16.msra.mxu0 %v1434_v2  ;;  %1228 = vmatprep.subr.bf16.mxu1 %v1452_v12  ;;  %v1462_v30 = vld [vmem:[%s1999_s2 + $0x78] sm:$0xff]   ;;  %v1464_v32 = vld [vmem:[%s1997_s1] sm:$0xff]   ;;  %v1473_v34 = vld [vmem:[%s2000_s4 + $0x8] sm:$0xff]  }
   0xc   :  { %1326 = vmatprep.subr.bf16.mxu0 %v1435_v3  ;;  %v1463_v31 = vld [vmem:[%s1999_s2 + $0x38] sm:$0xff]   ;;  %499 = vmatprep.mubr.bf16.mxu1 %v1464_v32  ;;  %v1472_v33 = vld [vmem:[%s2000_s4] sm:$0xff]   ;;  %v1474_v35 = vld [vmem:[%s2000_s4 + $0x10] sm:$0xff]  }
   0xd   :  { %v1465_v41 = vld [vmem:[%s1997_s1 + $0x8] sm:$0xff]   ;;  %v1466_v48 = vld [vmem:[%s1997_s1 + $0x10] sm:$0xff]   ;;  %v1467_v53 = vld [vmem:[%s1997_s1 + $0x18] sm:$0xff]  }
   0xe   :  { %1229 = vmatpush3.bf16.msra.mxu1 %v1453_v14  ;;  %v1468_v60 = vld [vmem:[%s1997_s1 + $0x20] sm:$0xff]   ;;  %v1469_v0 = vld [vmem:[%s1997_s1 + $0x28] sm:$0xff]   ;;  %v1470_v1 = vld [vmem:[%s1997_s1 + $0x30] sm:$0xff]  }
   0xf   :  { %1327 = vmatpush3.bf16.msra.mxu0 %v1435_v3  ;;  %1230 = vmatprep.subr.bf16.mxu1 %v1454_v15  ;;  %v1471_v2 = vld [vmem:[%s1997_s1 + $0x38] sm:$0xff]   ;;  %v1476_v4 = vld [vmem:[%s2000_s4 + $0x20] sm:$0xff]   ;;  %v1482_v10 = vld [vmem:[%s2001_s6 + $0x10] sm:$0xff]  }
  0x10   :  { %1328 = vmatprep.subr.bf16.mxu0 %v1436_v5  ;;  %v1475_v3 = vld [vmem:[%s2000_s4 + $0x18] sm:$0xff]   ;;  %v1480_v8 = vld [vmem:[%s2001_s6] sm:$0xff]  }
  0x11   :  { %v1479_v7 = vld [vmem:[%s2000_s4 + $0x38] sm:$0xff]   ;;  %v1759_v12 = vld [vmem:[%s2001_s6 + $0x20] sm:$0xff]  }
  0x12   :  { %1231 = vmatpush3.bf16.msra.mxu1 %v1455_v16  ;;  %v1753_v11 = vld [vmem:[%s2001_s6 + $0x18] sm:$0xff]   ;;  %v1774_v15 = vld [vmem:[%s2002_s3] ss:$0 sm:$0xff] }
  0x13   :  { %1329 = vmatpush3.bf16.msra.mxu0 %v1436_v5  ;;  %1232 = vmatprep.subr.bf16.mxu1 %v1456_v18  ;;  %v1477_v5 = vld [vmem:[%s2000_s4 + $0x28] sm:$0xff]  }
  0x14   :  { %1330 = vmatprep.subr.bf16.mxu0 %v1437_v6 }
  0x16   :  { %1233 = vmatpush3.bf16.msra.mxu1 %v1457_v20 }
  0x17   :  { %1331 = vmatpush3.bf16.msra.mxu0 %v1437_v6  ;;  %1234 = vmatprep.subr.bf16.mxu1 %v1458_v21  ;;  %v1478_v6 = vld [vmem:[%s2000_s4 + $0x30] sm:$0xff]  }
  0x18   :  { %1332 = vmatprep.subr.bf16.mxu0 %v1438_v9 }
  0x1a   :  { %1235 = vmatpush3.bf16.msra.mxu1 %v1459_v22 }
  0x1b   :  { %1333 = vmatpush3.bf16.msra.mxu0 %v1438_v9  ;;  %1236 = vmatprep.subr.bf16.mxu1 %v1460_v23  ;;  %v1481_v9 = vld [vmem:[%s2001_s6 + $0x8] sm:$0xff]  }
  0x1c   :  { %1334 = vmatprep.subr.bf16.mxu0 %v1439_v13 }
  0x1e   :  { %1237 = vmatpush3.bf16.msra.mxu1 %v1461_v26 }
  0x1f   :  { %1335 = vmatpush3.bf16.msra.mxu0 %v1439_v13  ;;  %1238 = vmatprep.subr.bf16.mxu1 %v1462_v30  ;;  %v1766_v13 = vld [vmem:[%s2001_s6 + $0x28] sm:$0xff]  }
  0x20   :  { %1352 = vmatprep.subr.bf16.mxu0 %v1472_v33 }
  0x22   :  { %1337 = vmatmul.mubr.bf16.vlgmr.msra.gmra.mrb[0].mxu0 %v1441_v17  ;;  %1239 = vmatpush3.bf16.msra.mxu1 %v1463_v31 }
  0x23   :  { %1340 = vmatprep.mubr.bf16.mxu0 %v1442_v19  ;;  %1353 = vmatpush3.bf16.msra.mxu0 %v1472_v33 }
  0x24   :  { %1354 = vmatprep.subr.bf16.mxu0 %v1473_v34  ;;  %1416 = vmatprep.subr.bf16.mxu1 %v1480_v8 }
  0x27   :  { %1355 = vmatpush3.bf16.msra.mxu0 %v1473_v34 }
  0x28   :  { %1356 = vmatprep.subr.bf16.mxu0 %v1474_v35 }
  0x2a   :  { %1341 = vmatmul.mubr.bf16.gmra.mrb[4].mxu0 %v1443_v24 }
  0x2b   :  { %1344 = vmatprep.mubr.bf16.mxu0 %v1444_v25  ;;  %1357 = vmatpush3.bf16.msra.mxu0 %v1474_v35 }
  0x2c   :  { %1358 = vmatprep.subr.bf16.mxu0 %v1475_v3 }
  0x2f   :  { %1359 = vmatpush3.bf16.msra.mxu0 %v1475_v3 }
  0x30   :  { %1360 = vmatprep.subr.bf16.mxu0 %v1476_v4 }
  0x32   :  { %1345 = vmatmul.mubr.bf16.gmra.mrb[8].mxu0 %v1445_v27 }
  0x33   :  { %1348 = vmatprep.mubr.bf16.mxu0 %v1446_v28  ;;  %1361 = vmatpush3.bf16.msra.mxu0 %v1476_v4 }
  0x34   :  { %1362 = vmatprep.subr.bf16.mxu0 %v1477_v5 }
  0x37   :  { %1363 = vmatpush3.bf16.msra.mxu0 %v1477_v5 }
  0x38   :  { %1364 = vmatprep.subr.bf16.mxu0 %v1478_v6 }
  0x3a   :  { %1349 = vmatmul.mubr.bf16.gmra.mrb[12].mxu0 %v1447_v29 }
  0x3b   :  { %1365 = vmatpush3.bf16.msra.mxu0 %v1478_v6 }
  0x3c   :  { %1366 = vmatprep.subr.bf16.mxu0 %v1479_v7 }
  0x3f   :  { %1367 = vmatpush3.bf16.msra.mxu0 %v1479_v7 }
  0x40   :  { %1384 = vmatprep.subr.bf16.mxu0 %v1480_v8 }
  0xf5   :  { %v1338_v36 = vpop.f32.mrb[0].mxu0 }
  0xf6   :  { %v193_v37 = vpop.f32.mrb[1].mxu0 }
  0xf7   :  { %v1339_v38 = vpop.f32.mrb[2].mxu0 }
  0xf8   :  { %v277_v39 = vpack.c.bf16 %v1339_v38, %v1338_v36  ;;  %v196_v40 = vpop.f32.mrb[3].mxu0 }
  0xf9   :  { %v276_v42 = vpack.c.bf16 %v196_v40, %v193_v37 }
  0xfb   :  { %500 = vmatmul.mubr.bf16.vlgmr.msra.gmra.mrb[0].mxu1 %v276_v42 }
  0xfc   :  { %507 = vmatprep.mubr.bf16.mxu1 %v1465_v41  ;;  %1424 = vmatpush3.bf16.msra.mxu1 %v1480_v8 }
  0xfd   :  { %v1342_v43 = vpop.f32.mrb[4].mxu0  ;;  %1417 = vmatprep.subr.bf16.mxu1 %v1481_v9 }
  0xfe   :  { %v209_v44 = vpop.f32.mrb[5].mxu0 }
  0xff   :  { %v1343_v45 = vpop.f32.mrb[6].mxu0 }
 0x100   :  { %v279_v46 = vpack.c.bf16 %v1343_v45, %v1342_v43  ;;  %v212_v47 = vpop.f32.mrb[7].mxu0  ;;  %1425 = vmatpush3.bf16.msra.mxu1 %v1481_v9 }
 0x101   :  { %v278_v49 = vpack.c.bf16 %v212_v47, %v209_v44  ;;  %1418 = vmatprep.subr.bf16.mxu1 %v1482_v10 }
 0x103   :  { %508 = vmatmul.mubr.bf16.gmra.mrb[4].mxu1 %v277_v39 }
 0x104   :  { %515 = vmatprep.mubr.bf16.mxu1 %v1466_v48  ;;  %1426 = vmatpush3.bf16.msra.mxu1 %v1482_v10 }
 0x105   :  { %v1346_v50 = vpop.f32.mrb[8].mxu0  ;;  %1419 = vmatprep.subr.bf16.mxu1 %v1753_v11 }
 0x106   :  { %v225_v51 = vpop.f32.mrb[9].mxu0 }
 0x107   :  { %v1347_v52 = vpop.f32.mrb[10].mxu0 }
 0x108   :  { %v281_v54 = vpack.c.bf16 %v1347_v52, %v1346_v50  ;;  %v228_v55 = vpop.f32.mrb[11].mxu0  ;;  %1427 = vmatpush3.bf16.msra.mxu1 %v1753_v11 }
 0x109   :  { %v280_v56 = vpack.c.bf16 %v228_v55, %v225_v51  ;;  %1420 = vmatprep.subr.bf16.mxu1 %v1759_v12 }
 0x10b   :  { %516 = vmatmul.mubr.bf16.gmra.mrb[8].mxu1 %v278_v49 }
 0x10c   :  { %523 = vmatprep.mubr.bf16.mxu1 %v1467_v53  ;;  %1428 = vmatpush3.bf16.msra.mxu1 %v1759_v12 }
 0x10d   :  { %v1350_v57 = vpop.f32.mrb[12].mxu0  ;;  %1421 = vmatprep.subr.bf16.mxu1 %v1766_v13 }
 0x10e   :  { %v241_v58 = vpop.f32.mrb[13].mxu0 }
 0x10f   :  { %v1351_v59 = vpop.f32.mrb[14].mxu0 }
 0x110   :  { %v283_v61 = vpack.c.bf16 %v1351_v59, %v1350_v57  ;;  %v244_v62 = vpop.f32.mrb[15].mxu0  ;;  %1429 = vmatpush3.bf16.msra.mxu1 %v1766_v13 }
 0x111   :  { %v282_v63 = vpack.c.bf16 %v244_v62, %v241_v58 }
 0x113   :  { %524 = vmatmul.mubr.bf16.gmra.mrb[12].mxu1 %v279_v46 }
 0x114   :  { %531 = vmatprep.mubr.bf16.mxu1 %v1468_v60 }
 0x11b   :  { %532 = vmatmul.mubr.bf16.gmra.mrb[16].mxu1 %v280_v56 }
 0x11c   :  { %539 = vmatprep.mubr.bf16.mxu1 %v1469_v0 }
 0x123   :  { %540 = vmatmul.mubr.bf16.gmra.mrb[20].mxu1 %v281_v54 }
 0x124   :  { %547 = vmatprep.mubr.bf16.mxu1 %v1470_v1 }
 0x12b   :  { %548 = vmatmul.mubr.bf16.gmra.mrb[24].mxu1 %v282_v63 }
 0x12c   :  { %555 = vmatprep.mubr.bf16.mxu1 %v1471_v2 }
 0x133   :  { %556 = vmatmul.mubr.bf16.gmra.mrb[28].mxu1 %v283_v61 }
 0x1ce   :  { %v1240_v14 = vpop.f32.mrb[0].mxu1 }
 0x1cf   :  { %v1241_v16 = vpop.f32.mrb[1].mxu1 }
 0x1d0   :  { %v1242_v17 = vadd.f32 %v1241_v16, %v1240_v14  ;;  %v1243_v18 = vpop.f32.mrb[2].mxu1 }
 0x1d1   :  { %v1244_v19 = vpop.f32.mrb[3].mxu1 }
 0x1d2   :  { %v502_v20 = vadd.f32 %v1242_v17, %v1774_v15  ;;  %v1245_v21 = vadd.f32 %v1244_v19, %v1243_v18 }
 0x1d4   :  { %v505_v22 = vadd.f32 %v1245_v21, %v1774_v15  ;;  %v564_v23 = vmax.f32 %v502_v20, 0.0 }
 0x1d6   :  { %v565_v24 = vmax.f32 %v505_v22, 0.0  ;;  %v1246_v25 = vpop.f32.mrb[4].mxu1 }
 0x1d7   :  { %v1247_v26 = vpop.f32.mrb[5].mxu1 }
 0x1d8   :  { %v1248_v27 = vadd.f32 %v1247_v26, %v1246_v25  ;;  %v1249_v28 = vpop.f32.mrb[6].mxu1  ;;  %v580_v29 = vpack.c.bf16 %v565_v24, %v564_v23 }
 0x1d9   :  { %v1250_v30 = vpop.f32.mrb[7].mxu1 }
 0x1da   :  { %v510_v31 = vadd.f32 %v1248_v27, %v1774_v15  ;;  %v1251_v32 = vadd.f32 %v1250_v30, %v1249_v28  ;;  %1368 = vmatprep.mubr.bf16.mxu0 %v580_v29 }
 0x1dc   :  { %v513_v33 = vadd.f32 %v1251_v32, %v1774_v15  ;;  %v566_v34 = vmax.f32 %v510_v31, 0.0 }
 0x1de   :  { %v567_v35 = vmax.f32 %v513_v33, 0.0  ;;  %v1252_v36 = vpop.f32.mrb[8].mxu1 }
 0x1df   :  { %v1253_v37 = vpop.f32.mrb[9].mxu1 }
 0x1e0   :  { %v581_v38 = vpack.c.bf16 %v567_v35, %v566_v34  ;;  %v1254_v39 = vadd.f32 %v1253_v37, %v1252_v36  ;;  %v1255_v40 = vpop.f32.mrb[10].mxu1 }
 0x1e1   :  { %v1256_v41 = vpop.f32.mrb[11].mxu1 }
 0x1e2   :  { %v518_v42 = vadd.f32 %v1254_v39, %v1774_v15  ;;  %v1257_v43 = vadd.f32 %v1256_v41, %v1255_v40  ;;  %1369 = vmatmul.mubr.bf16.vlgmr.msra.gmra.mrb[16].mxu0 %v581_v38  ;;  %v1486_v40 = vld [vmem:[%s2001_s6 + $0x30] sm:$0xff]   ;;  %v1487_v41 = vld [vmem:[%s2001_s6 + $0x38] sm:$0xff]  }
 0x1e3   :  { %1385 = vmatpush3.bf16.msra.mxu0 %v1480_v8  ;;  %1422 = vmatprep.subr.bf16.mxu1 %v1486_v40 }
 0x1e4   :  { %v521_v44 = vadd.f32 %v1257_v43, %v1774_v15  ;;  %1386 = vmatprep.subr.bf16.mxu0 %v1481_v9  ;;  %v568_v45 = vmax.f32 %v518_v42, 0.0  ;;  %1430 = vmatpush3.bf16.msra.mxu1 %v1486_v40 }
 0x1e5   :  { %1423 = vmatprep.subr.bf16.mxu1 %v1487_v41 }
 0x1e6   :  { %v569_v46 = vmax.f32 %v521_v44, 0.0  ;;  %v1258_v47 = vpop.f32.mrb[12].mxu1 }
 0x1e7   :  { %v1259_v48 = vpop.f32.mrb[13].mxu1  ;;  %1387 = vmatpush3.bf16.msra.mxu0 %v1481_v9 }
 0x1e8   :  { %v1260_v49 = vadd.f32 %v1259_v48, %v1258_v47  ;;  %v1261_v50 = vpop.f32.mrb[14].mxu1  ;;  %v582_v51 = vpack.c.bf16 %v569_v46, %v568_v45  ;;  %1388 = vmatprep.subr.bf16.mxu0 %v1482_v10  ;;  %1431 = vmatpush3.bf16.msra.mxu1 %v1487_v41 }
 0x1e9   :  { %v1262_v52 = vpop.f32.mrb[15].mxu1 }
 0x1ea   :  { %v526_v53 = vadd.f32 %v1260_v49, %v1774_v15  ;;  %v1263_v54 = vadd.f32 %v1262_v52, %v1261_v50  ;;  %1372 = vmatprep.mubr.bf16.mxu0 %v582_v51 }
 0x1eb   :  { %1389 = vmatpush3.bf16.msra.mxu0 %v1482_v10 }
 0x1ec   :  { %v529_v55 = vadd.f32 %v1263_v54, %v1774_v15  ;;  %1390 = vmatprep.subr.bf16.mxu0 %v1753_v11  ;;  %v570_v56 = vmax.f32 %v526_v53, 0.0 }
 0x1ee   :  { %v571_v57 = vmax.f32 %v529_v55, 0.0  ;;  %v1264_v58 = vpop.f32.mrb[16].mxu1 }
 0x1ef   :  { %v1265_v59 = vpop.f32.mrb[17].mxu1  ;;  %1391 = vmatpush3.bf16.msra.mxu0 %v1753_v11 }
 0x1f0   :  { %v1266_v60 = vadd.f32 %v1265_v59, %v1264_v58  ;;  %v1267_v61 = vpop.f32.mrb[18].mxu1  ;;  %v583_v62 = vpack.c.bf16 %v571_v57, %v570_v56  ;;  %1392 = vmatprep.subr.bf16.mxu0 %v1759_v12 }
 0x1f1   :  { %v1268_v63 = vpop.f32.mrb[19].mxu1 }
 0x1f2   :  { %v534_v0 = vadd.f32 %v1266_v60, %v1774_v15  ;;  %v1269_v1 = vadd.f32 %v1268_v63, %v1267_v61  ;;  %1373 = vmatmul.mubr.bf16.gmra.mrb[20].mxu0 %v583_v62 }
 0x1f3   :  { %1393 = vmatpush3.bf16.msra.mxu0 %v1759_v12 }
 0x1f4   :  { %v537_v2 = vadd.f32 %v1269_v1, %v1774_v15  ;;  %1394 = vmatprep.subr.bf16.mxu0 %v1766_v13  ;;  %v572_v3 = vmax.f32 %v534_v0, 0.0 }
 0x1f6   :  { %v573_v4 = vmax.f32 %v537_v2, 0.0  ;;  %v1270_v5 = vpop.f32.mrb[20].mxu1 }
 0x1f7   :  { %v1271_v6 = vpop.f32.mrb[21].mxu1  ;;  %1395 = vmatpush3.bf16.msra.mxu0 %v1766_v13 }
 0x1f8   :  { %v1272_v7 = vadd.f32 %v1271_v6, %v1270_v5  ;;  %v1273_v8 = vpop.f32.mrb[22].mxu1  ;;  %v584_v9 = vpack.c.bf16 %v573_v4, %v572_v3  ;;  %1396 = vmatprep.subr.bf16.mxu0 %v1486_v40 }
 0x1f9   :  { %v1274_v10 = vpop.f32.mrb[23].mxu1 }
 0x1fa   :  { %v542_v11 = vadd.f32 %v1272_v7, %v1774_v15  ;;  %v1275_v14 = vadd.f32 %v1274_v10, %v1273_v8  ;;  %1376 = vmatprep.mubr.bf16.mxu0 %v584_v9 }
 0x1fb   :  { %1397 = vmatpush3.bf16.msra.mxu0 %v1486_v40 }
 0x1fc   :  { %v545_v12 = vadd.f32 %v1275_v14, %v1774_v15  ;;  %v574_v16 = vmax.f32 %v542_v11, 0.0  ;;  %1398 = vmatprep.subr.bf16.mxu0 %v1487_v41 }
 0x1fe   :  { %v575_v17 = vmax.f32 %v545_v12, 0.0  ;;  %v1276_v18 = vpop.f32.mrb[24].mxu1 }
 0x1ff   :  { %v1277_v19 = vpop.f32.mrb[25].mxu1  ;;  %1399 = vmatpush3.bf16.msra.mxu0 %v1487_v41 }
 0x200   :  { %v1278_v20 = vadd.f32 %v1277_v19, %v1276_v18  ;;  %v1279_v21 = vpop.f32.mrb[26].mxu1  ;;  %v585_v22 = vpack.c.bf16 %v575_v17, %v574_v16 }
 0x201   :  { %v1280_v23 = vpop.f32.mrb[27].mxu1 }
 0x202   :  { %v550_v13 = vadd.f32 %v1278_v20, %v1774_v15  ;;  %v1281_v24 = vadd.f32 %v1280_v23, %v1279_v21  ;;  %1377 = vmatmul.mubr.bf16.gmra.mrb[24].mxu0 %v585_v22 }
 0x204   :  { %v553_v25 = vadd.f32 %v1281_v24, %v1774_v15  ;;  %v576_v26 = vmax.f32 %v550_v13, 0.0 }
 0x206   :  { %v577_v27 = vmax.f32 %v553_v25, 0.0  ;;  %v1282_v28 = vpop.f32.mrb[28].mxu1 }
 0x207   :  { %v1283_v29 = vpop.f32.mrb[29].mxu1 }
 0x208   :  { %v1284_v30 = vadd.f32 %v1283_v29, %v1282_v28  ;;  %v1285_v31 = vpop.f32.mrb[30].mxu1  ;;  %v586_v32 = vpack.c.bf16 %v577_v27, %v576_v26 }
 0x209   :  { %v1286_v33 = vpop.f32.mrb[31].mxu1 }
 0x20a   :  { %v558_v34 = vadd.f32 %v1284_v30, %v1774_v15  ;;  %v1287_v35 = vadd.f32 %v1286_v33, %v1285_v31  ;;  %1380 = vmatprep.mubr.bf16.mxu0 %v586_v32 }
 0x20c   :  { %v561_v36 = vadd.f32 %v1287_v35, %v1774_v15  ;;  %v578_v37 = vmax.f32 %v558_v34, 0.0  ;;  %v1190_v15 = vld [vmem:[%s2003_s5] ss:$0 sm:$0xff]  ;;  %v948_v35 = vlaneseq }
 0x20e   :  { %v579_v38 = vmax.f32 %v561_v36, 0.0  ;;  %v1807_v36 = vand.u32 127, %v948_v35 }
 0x210   :  { %v587_v39 = vpack.c.bf16 %v579_v38, %v578_v37  ;;  %v1199_v37 = vld [vmem:[%s2004_s7] ss:$0 sm:$0xff]  ;;  %vm950_vm0 = vcmp.lt.s32.totalorder %v1807_v36, 8 }
 0x212   :  { %1381 = vmatmul.mubr.bf16.gmra.mrb[28].mxu0 %v587_v39 }
 0x2b5   :  { %v1370_v42 = vpop.f32.mrb[16].mxu0 }
 0x2b6   :  { %v702_v43 = vadd.f32 %v1370_v42, %v1190_v15  ;;  %v693_v44 = vpop.f32.mrb[17].mxu0 }
 0x2b7   :  { %v694_v45 = vadd.f32 %v1190_v15, %v693_v44  ;;  %v1371_v46 = vpop.f32.mrb[18].mxu0 }
 0x2b8   :  { %v705_v47 = vadd.f32 %v1371_v46, %v1190_v15  ;;  %v696_v48 = vpop.f32.mrb[19].mxu0  ;;  %v758_v50 = vmax.f32 %v702_v43, 0.0 }
 0x2b9   :  { %v697_v49 = vadd.f32 %v1190_v15, %v696_v48  ;;  %v756_v52 = vmax.f32 %v694_v45, 0.0 }
 0x2ba   :  { %v759_v51 = vmax.f32 %v705_v47, 0.0 }
 0x2bb   :  { %v757_v53 = vmax.f32 %v697_v49, 0.0 }
 0x2bc   :  { %v773_v54 = vpack.c.bf16 %v759_v51, %v758_v50 }
 0x2bd   :  { %v772_v55 = vpack.c.bf16 %v757_v53, %v756_v52 }
 0x2bf   :  { %1400 = vmatprep.mubr.bf16.mxu0 %v772_v55 }
 0x2c0   :  { %1401 = vmatmul.mubr.bf16.vlgmr.msra.gmra.mrb[32].mxu0 %v773_v54 }
 0x2c5   :  { %v1374_v56 = vpop.f32.mrb[20].mxu0 }
 0x2c6   :  { %v718_v57 = vadd.f32 %v1374_v56, %v1190_v15  ;;  %v709_v58 = vpop.f32.mrb[21].mxu0 }
 0x2c7   :  { %v710_v59 = vadd.f32 %v1190_v15, %v709_v58  ;;  %v1375_v60 = vpop.f32.mrb[22].mxu0 }
 0x2c8   :  { %v721_v61 = vadd.f32 %v1375_v60, %v1190_v15  ;;  %v712_v62 = vpop.f32.mrb[23].mxu0  ;;  %v762_v0 = vmax.f32 %v718_v57, 0.0 }
 0x2c9   :  { %v713_v63 = vadd.f32 %v1190_v15, %v712_v62  ;;  %v760_v2 = vmax.f32 %v710_v59, 0.0 }
 0x2ca   :  { %v763_v1 = vmax.f32 %v721_v61, 0.0 }
 0x2cb   :  { %v761_v3 = vmax.f32 %v713_v63, 0.0 }
 0x2cc   :  { %v775_v4 = vpack.c.bf16 %v763_v1, %v762_v0 }
 0x2cd   :  { %v774_v5 = vpack.c.bf16 %v761_v3, %v760_v2 }
 0x2cf   :  { %1404 = vmatprep.mubr.bf16.mxu0 %v774_v5 }
 0x2d0   :  { %1405 = vmatmul.mubr.bf16.gmra.mrb[36].mxu0 %v775_v4 }
 0x2d5   :  { %v1378_v6 = vpop.f32.mrb[24].mxu0 }
 0x2d6   :  { %v734_v7 = vadd.f32 %v1378_v6, %v1190_v15  ;;  %v725_v8 = vpop.f32.mrb[25].mxu0 }
 0x2d7   :  { %v726_v9 = vadd.f32 %v1190_v15, %v725_v8  ;;  %v1379_v10 = vpop.f32.mrb[26].mxu0 }
 0x2d8   :  { %v737_v11 = vadd.f32 %v1379_v10, %v1190_v15  ;;  %v728_v14 = vpop.f32.mrb[27].mxu0  ;;  %v766_v16 = vmax.f32 %v734_v7, 0.0 }
 0x2d9   :  { %v729_v12 = vadd.f32 %v1190_v15, %v728_v14  ;;  %v764_v18 = vmax.f32 %v726_v9, 0.0 }
 0x2da   :  { %v767_v17 = vmax.f32 %v737_v11, 0.0 }
 0x2db   :  { %v765_v19 = vmax.f32 %v729_v12, 0.0 }
 0x2dc   :  { %v777_v20 = vpack.c.bf16 %v767_v17, %v766_v16 }
 0x2dd   :  { %v776_v21 = vpack.c.bf16 %v765_v19, %v764_v18 }
 0x2df   :  { %1408 = vmatprep.mubr.bf16.mxu1 %v776_v21 }
 0x2e0   :  { %1409 = vmatmul.mubr.bf16.vlgmr.msra.gmra.mrb[32].mxu1 %v777_v20 }
 0x2e5   :  { %v1382_v22 = vpop.f32.mrb[28].mxu0 }
 0x2e6   :  { %v750_v23 = vadd.f32 %v1382_v22, %v1190_v15  ;;  %v741_v13 = vpop.f32.mrb[29].mxu0 }
 0x2e7   :  { %v742_v24 = vadd.f32 %v1190_v15, %v741_v13  ;;  %v1383_v25 = vpop.f32.mrb[30].mxu0 }
 0x2e8   :  { %v753_v26 = vadd.f32 %v1383_v25, %v1190_v15  ;;  %v744_v27 = vpop.f32.mrb[31].mxu0  ;;  %v770_v29 = vmax.f32 %v750_v23, 0.0 }
 0x2e9   :  { %v745_v28 = vadd.f32 %v1190_v15, %v744_v27  ;;  %v768_v31 = vmax.f32 %v742_v24, 0.0 }
 0x2ea   :  { %v771_v30 = vmax.f32 %v753_v26, 0.0 }
 0x2eb   :  { %v769_v32 = vmax.f32 %v745_v28, 0.0 }
 0x2ec   :  { %v779_v33 = vpack.c.bf16 %v771_v30, %v770_v29 }
 0x2ed   :  { %v778_v34 = vpack.c.bf16 %v769_v32, %v768_v31 }
 0x2ef   :  { %1412 = vmatprep.mubr.bf16.mxu1 %v778_v34 }
 0x2f0   :  { %1413 = vmatmul.mubr.bf16.gmra.mrb[36].mxu1 %v779_v33 }
 0x393   :  { %v1402_v38 = vpop.f32.mrb[32].mxu0 }
 0x394   :  { %v894_v39 = vadd.f32 %v1402_v38, %v1199_v37  ;;  %v885_v40 = vpop.f32.mrb[33].mxu0 }
 0x395   :  { %v886_v41 = vadd.f32 %v1199_v37, %v885_v40  ;;  %v1403_v15 = vpop.f32.mrb[34].mxu0 }
 0x396   :  { %v897_v42 = vadd.f32 %v1403_v15, %v1199_v37  ;;  %v888_v43 = vpop.f32.mrb[35].mxu0  ;;  %v953_v44 = vsel %vm950_vm0, %v894_v39, -1e+30 }
 0x397   :  { %v889_v45 = vadd.f32 %v1199_v37, %v888_v43  ;;  %971 = vmax.xlane.f32.xlu1 %v953_v44  ;;  %v951_v46 = vsel %vm950_vm0, %v886_v41, -1e+30 }
 0x398   :  { %967 = vmax.xlane.f32.xlu0 %v951_v46  ;;  %v954_v47 = vsel %vm950_vm0, %v897_v42, -1e+30 }
 0x399   :  { %v952_v48 = vsel %vm950_vm0, %v889_v45, -1e+30 }
 0x39b   :  { %973 = vmax.xlane.f32.xlu1 %v954_v47 }
 0x39c   :  { %969 = vmax.xlane.f32.xlu0 %v952_v48 }
 0x3a3   :  { %v1406_v49 = vpop.f32.mrb[36].mxu0 }
 0x3a4   :  { %v910_v50 = vadd.f32 %v1406_v49, %v1199_v37  ;;  %v901_v51 = vpop.f32.mrb[37].mxu0 }
 0x3a5   :  { %v1407_v52 = vpop.f32.mrb[38].mxu0  ;;  %v902_v53 = vadd.f32 %v1199_v37, %v901_v51 }
 0x3a6   :  { %v913_v54 = vadd.f32 %v1407_v52, %v1199_v37  ;;  %v904_v55 = vpop.f32.mrb[39].mxu0  ;;  %v957_v56 = vsel %vm950_vm0, %v910_v50, -1e+30 }
 0x3a7   :  { %979 = vmax.xlane.f32.xlu0 %v957_v56  ;;  %v905_v57 = vadd.f32 %v1199_v37, %v904_v55  ;;  %v1827_v59 = vsel %vm950_vm0, %v902_v53, -1e+30 }
 0x3a8   :  { %v958_v58 = vsel %vm950_vm0, %v913_v54, -1e+30 }
 0x3a9   :  { %981 = vmax.xlane.f32.xlu1 %v958_v58  ;;  %v1832_v60 = vsel %vm950_vm0, %v905_v57, -1e+30 }
 0x3ab   :  { %975 = vmax.xlane.f32.xlu0 %v1827_v59 }
 0x3ad   :  { %977 = vmax.xlane.f32.xlu1 %v1832_v60 }
 0x3b3   :  { %v1410_v61 = vpop.f32.mrb[32].mxu1 }
 0x3b4   :  { %v926_v62 = vadd.f32 %v1410_v61, %v1199_v37  ;;  %v917_v63 = vpop.f32.mrb[33].mxu1 }
 0x3b5   :  { %v1411_v0 = vpop.f32.mrb[34].mxu1  ;;  %v918_v1 = vadd.f32 %v1199_v37, %v917_v63 }
 0x3b6   :  { %v929_v2 = vadd.f32 %v1411_v0, %v1199_v37  ;;  %v920_v3 = vpop.f32.mrb[35].mxu1  ;;  %v1837_v4 = vsel %vm950_vm0, %v926_v62, -1e+30 }
 0x3b7   :  { %987 = vmax.xlane.f32.xlu0 %v1837_v4  ;;  %v921_v5 = vadd.f32 %v1199_v37, %v920_v3  ;;  %v1847_v7 = vsel %vm950_vm0, %v918_v1, -1e+30 }
 0x3b8   :  { %v1842_v6 = vsel %vm950_vm0, %v929_v2, -1e+30 }
 0x3b9   :  { %989 = vmax.xlane.f32.xlu1 %v1842_v6  ;;  %v1852_v8 = vsel %vm950_vm0, %v921_v5, -1e+30 }
 0x3bb   :  { %983 = vmax.xlane.f32.xlu0 %v1847_v7 }
 0x3bd   :  { %985 = vmax.xlane.f32.xlu1 %v1852_v8 }
 0x3c3   :  { %v1414_v9 = vpop.f32.mrb[36].mxu1 }
 0x3c4   :  { %v933_v10 = vpop.f32.mrb[37].mxu1  ;;  %v942_v16 = vadd.f32 %v1414_v9, %v1199_v37 }
 0x3c5   :  { %v934_v11 = vadd.f32 %v1199_v37, %v933_v10  ;;  %v1415_v14 = vpop.f32.mrb[38].mxu1 }
 0x3c6   :  { %v936_v12 = vpop.f32.mrb[39].mxu1  ;;  %v945_v19 = vadd.f32 %v1415_v14, %v1199_v37  ;;  %v1867_v21 = vsel %vm950_vm0, %v942_v16, -1e+30 }
 0x3c7   :  { %v937_v17 = vadd.f32 %v1199_v37, %v936_v12  ;;  %v1857_v18 = vsel %vm950_vm0, %v934_v11, -1e+30 }
 0x3c8   :  { %991 = vmax.xlane.f32.xlu0 %v1857_v18  ;;  %v1872_v22 = vsel %vm950_vm0, %v945_v19, -1e+30 }
 0x3c9   :  { %v1862_v20 = vsel %vm950_vm0, %v937_v17, -1e+30 }
 0x3ca   :  { %993 = vmax.xlane.f32.xlu1 %v1862_v20 }
 0x3cc   :  { %995 = vmax.xlane.f32.xlu0 %v1867_v21 }
 0x3ce   :  { %997 = vmax.xlane.f32.xlu1 %v1872_v22 }
 0x424   :  { %v972_v23 = vpop.xlane.xlu1 %971 }
 0x425   :  { %v1875_v13 = vsub.f32 %v953_v44, %v972_v23  ;;  %v968_v24 = vpop.xlane.xlu0 %967 }
 0x426   :  { %v1877_v25 = vsub.f32 %v951_v46, %v968_v24 }
 0x427   :  { %v1019_v26 = vmul.f32 1.442695, %v1875_v13 }
 0x428   :  { %v1015_v27 = vmul.f32 1.442695, %v1877_v25  ;;  %v974_v28 = vpop.xlane.xlu1 %973 }
 0x429   :  { %1488 = vpow2.f32 %v1019_v26  ;;  %v1881_v29 = vsub.f32 %v954_v47, %v974_v28  ;;  %v970_v30 = vpop.xlane.xlu0 %969 }
 0x42a   :  { %v1883_v31 = vsub.f32 %v952_v48, %v970_v30  ;;  %1490 = vpow2.f32 %v1015_v27 }
 0x42b   :  { %v1021_v32 = vmul.f32 1.442695, %v1881_v29 }
 0x42c   :  { %v1017_v33 = vmul.f32 1.442695, %v1883_v31 }
 0x42d   :  { %1492 = vpow2.f32 %v1021_v32 }
 0x42e   :  { %1494 = vpow2.f32 %v1017_v33 }
 0x433   :  { %v1489_v34 = vpop.eup %1488 }
 0x434   :  { %v980_v35 = vpop.xlane.xlu0 %979  ;;  %1051 = vadd.xlane.f32.xlu0 %v1489_v34  ;;  %v1491_v37 = vpop.eup %1490 }
 0x435   :  { %v1887_v36 = vsub.f32 %v957_v56, %v980_v35 }
 0x436   :  { %v982_v38 = vpop.xlane.xlu1 %981 }
 0x437   :  { %v1493_v39 = vpop.eup %1492  ;;  %v1027_v40 = vmul.f32 1.442695, %v1887_v36  ;;  %v1890_v41 = vsub.f32 %v958_v58, %v982_v38 }
 0x438   :  { %v976_v15 = vpop.xlane.xlu0 %975  ;;  %1053 = vadd.xlane.f32.xlu1 %v1493_v39  ;;  %1047 = vadd.xlane.f32.xlu0 %v1491_v37  ;;  %v1495_v45 = vpop.eup %1494 }
 0x439   :  { %1496 = vpow2.f32 %v1027_v40  ;;  %v1029_v42 = vmul.f32 1.442695, %v1890_v41  ;;  %v1894_v43 = vsub.f32 %v1827_v59, %v976_v15 }
 0x43a   :  { %v978_v44 = vpop.xlane.xlu1 %977 }
 0x43b   :  { %1498 = vpow2.f32 %v1029_v42  ;;  %v1023_v46 = vmul.f32 1.442695, %v1894_v43  ;;  %v1898_v47 = vsub.f32 %v1832_v60, %v978_v44 }
 0x43c   :  { %1049 = vadd.xlane.f32.xlu1 %v1495_v45 }
 0x43d   :  { %1500 = vpow2.f32 %v1023_v46  ;;  %v1025_v48 = vmul.f32 1.442695, %v1898_v47 }
 0x43f   :  { %1502 = vpow2.f32 %v1025_v48 }
 0x443   :  { %v1497_v49 = vpop.eup %1496 }
 0x444   :  { %v988_v50 = vpop.xlane.xlu0 %987  ;;  %1059 = vadd.xlane.f32.xlu0 %v1497_v49 }
 0x445   :  { %v1499_v51 = vpop.eup %1498  ;;  %v1902_v52 = vsub.f32 %v1837_v4, %v988_v50 }
 0x446   :  { %v990_v53 = vpop.xlane.xlu1 %989  ;;  %1061 = vadd.xlane.f32.xlu1 %v1499_v51 }
 0x447   :  { %v1501_v54 = vpop.eup %1500  ;;  %v1035_v55 = vmul.f32 1.442695, %v1902_v52  ;;  %v1906_v56 = vsub.f32 %v1842_v6, %v990_v53 }
 0x448   :  { %v984_v57 = vpop.xlane.xlu0 %983  ;;  %1055 = vadd.xlane.f32.xlu0 %v1501_v54 }
 0x449   :  { %v1503_v58 = vpop.eup %1502  ;;  %1504 = vpow2.f32 %v1035_v55  ;;  %v1037_v59 = vmul.f32 1.442695, %v1906_v56  ;;  %v1910_v60 = vsub.f32 %v1847_v7, %v984_v57 }
 0x44a   :  { %v986_v61 = vpop.xlane.xlu1 %985  ;;  %1057 = vadd.xlane.f32.xlu1 %v1503_v58 }
 0x44b   :  { %1506 = vpow2.f32 %v1037_v59  ;;  %v1031_v62 = vmul.f32 1.442695, %v1910_v60  ;;  %v1914_v63 = vsub.f32 %v1852_v8, %v986_v61 }
 0x44d   :  { %1508 = vpow2.f32 %v1031_v62  ;;  %v1033_v0 = vmul.f32 1.442695, %v1914_v63 }
 0x44f   :  { %1510 = vpow2.f32 %v1033_v0 }
 0x453   :  { %v1505_v1 = vpop.eup %1504 }
 0x454   :  { %1067 = vadd.xlane.f32.xlu0 %v1505_v1 }
 0x455   :  { %v1507_v2 = vpop.eup %1506  ;;  %v992_v3 = vpop.xlane.xlu0 %991 }
 0x456   :  { %v1918_v4 = vsub.f32 %v1857_v18, %v992_v3  ;;  %1069 = vadd.xlane.f32.xlu1 %v1507_v2 }
 0x457   :  { %v1509_v5 = vpop.eup %1508  ;;  %v994_v6 = vpop.xlane.xlu1 %993 }
 0x458   :  { %v1039_v7 = vmul.f32 1.442695, %v1918_v4  ;;  %v1922_v9 = vsub.f32 %v1862_v20, %v994_v6  ;;  %1063 = vadd.xlane.f32.xlu0 %v1509_v5 }
 0x459   :  { %v1511_v8 = vpop.eup %1510  ;;  %v996_v10 = vpop.xlane.xlu0 %995 }
 0x45a   :  { %1512 = vpow2.f32 %v1039_v7  ;;  %v1041_v11 = vmul.f32 1.442695, %v1922_v9  ;;  %v1926_v14 = vsub.f32 %v1867_v21, %v996_v10  ;;  %1065 = vadd.xlane.f32.xlu1 %v1511_v8 }
 0x45b   :  { %v998_v12 = vpop.xlane.xlu1 %997 }
 0x45c   :  { %1514 = vpow2.f32 %v1041_v11  ;;  %v1043_v16 = vmul.f32 1.442695, %v1926_v14  ;;  %v1930_v17 = vsub.f32 %v1872_v22, %v998_v12 }
 0x45e   :  { %1516 = vpow2.f32 %v1043_v16  ;;  %v1045_v18 = vmul.f32 1.442695, %v1930_v17 }
 0x460   :  { %1518 = vpow2.f32 %v1045_v18 }
 0x464   :  { %v1513_v19 = vpop.eup %1512 }
 0x465   :  { %1071 = vadd.xlane.f32.xlu0 %v1513_v19 }
 0x466   :  { %v1515_v20 = vpop.eup %1514 }
 0x467   :  { %1073 = vadd.xlane.f32.xlu1 %v1515_v20 }
 0x468   :  { %v1517_v23 = vpop.eup %1516 }
 0x469   :  { %1075 = vadd.xlane.f32.xlu0 %v1517_v23 }
 0x46a   :  { %v1519_v21 = vpop.eup %1518 }
 0x46b   :  { %1077 = vadd.xlane.f32.xlu1 %v1519_v21 }
 0x4c1   :  { %v1052_v24 = vpop.xlane.xlu0 %1051 }
 0x4c2   :  { %1520 = vlog2.f32 %v1052_v24 }
 0x4c5   :  { %v1054_v26 = vpop.xlane.xlu1 %1053  ;;  %v1048_v27 = vpop.xlane.xlu0 %1047 }
 0x4c6   :  { %1522 = vlog2.f32 %v1054_v26 }
 0x4c7   :  { %1524 = vlog2.f32 %v1048_v27 }
 0x4c9   :  { %v1050_v22 = vpop.xlane.xlu1 %1049 }
 0x4ca   :  { %1526 = vlog2.f32 %v1050_v22 }
 0x4cc   :  { %v1521_v28 = vpop.eup %1520 }
 0x4cd   :  { %v1084_v30 = vmul.f32 0.6931472, %v1521_v28 }
 0x4cf   :  { %v1113_v32 = vsub.f32 %v1875_v13, %v1084_v30 }
 0x4d0   :  { %v1523_v33 = vpop.eup %1522 }
 0x4d1   :  { %v1525_v34 = vpop.eup %1524  ;;  %1129 = vst [vmem:[%s2005_s8 + $0x10] sm:$0xff] %v1113_v32  ;;  %v1086_v35 = vmul.f32 0.6931472, %v1523_v33  ;;  %v1060_v37 = vpop.xlane.xlu0 %1059 }
 0x4d2   :  { %v1080_v38 = vmul.f32 0.6931472, %v1525_v34  ;;  %1528 = vlog2.f32 %v1060_v37 }
 0x4d3   :  { %v1114_v39 = vsub.f32 %v1881_v29, %v1086_v35  ;;  %v1062_v40 = vpop.xlane.xlu1 %1061 }
 0x4d4   :  { %v1527_v15 = vpop.eup %1526  ;;  %v1111_v42 = vsub.f32 %v1877_v25, %v1080_v38  ;;  %1530 = vlog2.f32 %v1062_v40 }
 0x4d5   :  { %1130 = vst [vmem:[%s2005_s8 + $0x18] sm:$0xff] %v1114_v39  ;;  %v1082_v13 = vmul.f32 0.6931472, %v1527_v15  ;;  %v1056_v44 = vpop.xlane.xlu0 %1055 }
 0x4d6   :  { %1127 = vst [vmem:[%s2005_s8] sm:$0xff] %v1111_v42  ;;  %1532 = vlog2.f32 %v1056_v44 }
 0x4d7   :  { %v1112_v45 = vsub.f32 %v1883_v31, %v1082_v13  ;;  %v1058_v46 = vpop.xlane.xlu1 %1057 }
 0x4d8   :  { %1534 = vlog2.f32 %v1058_v46 }
 0x4d9   :  { %1128 = vst [vmem:[%s2005_s8 + $0x8] sm:$0xff] %v1112_v45 }
 0x4dc   :  { %v1529_v25 = vpop.eup %1528 }
 0x4dd   :  { %v1092_v29 = vmul.f32 0.6931472, %v1529_v25 }
 0x4de   :  { %v1531_v48 = vpop.eup %1530 }
 0x4df   :  { %v1117_v49 = vsub.f32 %v1887_v36, %v1092_v29  ;;  %v1094_v50 = vmul.f32 0.6931472, %v1531_v48 }
 0x4e0   :  { %v1533_v51 = vpop.eup %1532 }
 0x4e1   :  { %1133 = vst [vmem:[%s2005_s8 + $0x30] sm:$0xff] %v1117_v49  ;;  %v1118_v53 = vsub.f32 %v1890_v41, %v1094_v50  ;;  %v1088_v31 = vmul.f32 0.6931472, %v1533_v51  ;;  %v1068_v54 = vpop.xlane.xlu0 %1067 }
 0x4e2   :  { %v1535_v55 = vpop.eup %1534  ;;  %1536 = vlog2.f32 %v1068_v54 }
 0x4e3   :  { %1134 = vst [vmem:[%s2005_s8 + $0x38] sm:$0xff] %v1118_v53  ;;  %v1115_v57 = vsub.f32 %v1894_v43, %v1088_v31  ;;  %v1090_v58 = vmul.f32 0.6931472, %v1535_v55  ;;  %v1070_v36 = vpop.xlane.xlu1 %1069 }
 0x4e4   :  { %1538 = vlog2.f32 %v1070_v36 }
 0x4e5   :  { %1131 = vst [vmem:[%s2005_s8 + $0x20] sm:$0xff] %v1115_v57  ;;  %v1116_v59 = vsub.f32 %v1898_v47, %v1090_v58  ;;  %v1064_v41 = vpop.xlane.xlu0 %1063 }
 0x4e6   :  { %1540 = vlog2.f32 %v1064_v41 }
 0x4e7   :  { %1132 = vst [vmem:[%s2005_s8 + $0x28] sm:$0xff] %v1116_v59  ;;  %v1066_v61 = vpop.xlane.xlu1 %1065 }
 0x4e8   :  { %1542 = vlog2.f32 %v1066_v61 }
 0x4ec   :  { %v1537_v62 = vpop.eup %1536 }
 0x4ed   :  { %v1100_v0 = vmul.f32 0.6931472, %v1537_v62 }
 0x4ee   :  { %v1539_v43 = vpop.eup %1538 }
 0x4ef   :  { %v1121_v1 = vsub.f32 %v1902_v52, %v1100_v0  ;;  %v1102_v2 = vmul.f32 0.6931472, %v1539_v43 }
 0x4f0   :  { %v1541_v3 = vpop.eup %1540 }
 0x4f1   :  { %1137 = vst [vmem:[%s2005_s8 + $0x50] sm:$0xff] %v1121_v1  ;;  %v1122_v47 = vsub.f32 %v1906_v56, %v1102_v2  ;;  %v1096_v5 = vmul.f32 0.6931472, %v1541_v3 }
 0x4f2   :  { %v1543_v6 = vpop.eup %1542  ;;  %v1072_v7 = vpop.xlane.xlu0 %1071 }
 0x4f3   :  { %1138 = vst [vmem:[%s2005_s8 + $0x58] sm:$0xff] %v1122_v47  ;;  %v1119_v8 = vsub.f32 %v1910_v60, %v1096_v5  ;;  %v1098_v10 = vmul.f32 0.6931472, %v1543_v6  ;;  %1544 = vlog2.f32 %v1072_v7 }
 0x4f4   :  { %v1074_v52 = vpop.xlane.xlu1 %1073 }
 0x4f5   :  { %1135 = vst [vmem:[%s2005_s8 + $0x40] sm:$0xff] %v1119_v8  ;;  %v1120_v11 = vsub.f32 %v1914_v63, %v1098_v10  ;;  %1546 = vlog2.f32 %v1074_v52 }
 0x4f6   :  { %v1076_v56 = vpop.xlane.xlu0 %1075 }
 0x4f7   :  { %1136 = vst [vmem:[%s2005_s8 + $0x48] sm:$0xff] %v1120_v11  ;;  %1548 = vlog2.f32 %v1076_v56 }
 0x4f8   :  { %v1078_v12 = vpop.xlane.xlu1 %1077 }
 0x4f9   :  { %1550 = vlog2.f32 %v1078_v12 }
 0x4fd   :  { %v1545_v16 = vpop.eup %1544 }
 0x4fe   :  { %v1104_v60 = vmul.f32 0.6931472, %v1545_v16 }
 0x4ff   :  { %v1547_v18 = vpop.eup %1546 }
 0x500   :  { %v1123_v19 = vsub.f32 %v1918_v4, %v1104_v60  ;;  %v1106_v20 = vmul.f32 0.6931472, %v1547_v18 }
 0x501   :  { %v1549_v23 = vpop.eup %1548 }
 0x502   :  { %1139 = vst [vmem:[%s2005_s8 + $0x60] sm:$0xff] %v1123_v19  ;;  %v1124_v63 = vsub.f32 %v1922_v9, %v1106_v20  ;;  %v1108_v21 = vmul.f32 0.6931472, %v1549_v23 }
 0x503   :  { %v1551_v24 = vpop.eup %1550 }
 0x504   :  { %1140 = vst [vmem:[%s2005_s8 + $0x68] sm:$0xff] %v1124_v63  ;;  %v1125_v26 = vsub.f32 %v1926_v14, %v1108_v21  ;;  %v1110_v27 = vmul.f32 0.6931472, %v1551_v24 }
 0x506   :  { %1141 = vst [vmem:[%s2005_s8 + $0x70] sm:$0xff] %v1125_v26  ;;  %v1126_v4 = vsub.f32 %v1930_v17, %v1110_v27 }
 0x508   :  { %1142 = vst [vmem:[%s2005_s8 + $0x78] sm:$0xff] %v1126_v4 }

</bundles_post_ra>
